<compile_context>
chip_gen: v7x
topology: tpu7x:2x2x1
jax: 0.10.0
libtpu: 0.0.40
codegen_flags: <defaults>
</compile_context>

<pallas_src>
import math
import jax
import jax.numpy as jnp
from jax.experimental import pallas as pl
from jax.experimental.pallas import tpu as pltpu

EPS = 1e-5            # nn.LayerNorm default
BF16 = jnp.bfloat16

# Row indices inside the packed per-layer vector slab [L, 18, H].
(ROW_LN0W, ROW_LN0B, ROW_LN1W, ROW_LN1B, ROW_LN2W, ROW_LN2B,
 ROW_NEG_EXP_TD, ROW_TFIRST,
 ROW_TMK, ROW_1M_TMK, ROW_TMV, ROW_1M_TMV, ROW_TMR, ROW_1M_TMR,
 ROW_FMK, ROW_1M_FMK, ROW_FMR, ROW_1M_FMR) = range(18)
N_VEC_ROWS = 18


def _layernorm(x, w, b):
    mu = jnp.mean(x, axis=-1, keepdims=True)
    var = jnp.mean(jnp.square(x - mu), axis=-1, keepdims=True)
    return (x - mu) * jax.lax.rsqrt(var + EPS) * w + b


def _hardsigmoid(x):
    # torch.nn.Hardsigmoid: clip(x/6 + 1/2, 0, 1)
    return jnp.clip(x / 6.0 + 0.5, 0.0, 1.0)


def _mm(x_f32, w_bf16):
    # bf16 x bf16 -> f32 accumulation on the MXU
    return jnp.dot(x_f32.astype(BF16), w_bf16, preferred_element_type=jnp.float32)


# ----------------------------------------------------------------------------
# Single Pallas kernel: the whole RWKV layer stack, grid over layers.
# ----------------------------------------------------------------------------
def _stack_kernel(x_emb_ref, state_ref, vec_ref,
                  wk_ref, wv_ref, wr_ref, wo_ref,
                  fwk_ref, fwr_ref, fwv_ref,
                  x_ref, ns_ref):
    l = pl.program_id(0)

    vec = vec_ref[...]                    # [18, H] f32 per-layer constants
    row = lambda i: vec[i:i + 1, :]       # [1, H]

    # Layer 0: initialize the resident activation with ln0(embedding).
    @pl.when(l == 0)
    def _():
        x_ref[...] = _layernorm(x_emb_ref[...], row(ROW_LN0W), row(ROW_LN0B))

    x = x_ref[...]                        # running residual stream, f32
    sA, sB, sp = state_ref[0], state_ref[1], state_ref[2]
    sx, sffn = state_ref[3], state_ref[4]

    # ---------------- time-mix (attention) ----------------
    xn = _layernorm(x, row(ROW_LN1W), row(ROW_LN1B))
    xk = xn * row(ROW_TMK) + sx * row(ROW_1M_TMK)
    xv = xn * row(ROW_TMV) + sx * row(ROW_1M_TMV)
    xr = xn * row(ROW_TMR) + sx * row(ROW_1M_TMR)

    k = _mm(xk, wk_ref[...])
    v = _mm(xv, wv_ref[...])
    r = _hardsigmoid(_mm(xr, wr_ref[...]))

    ww = row(ROW_TFIRST) + k
    p = jnp.maximum(sp, ww)
    e1 = jnp.exp(sp - p)
    e2 = jnp.exp(ww - p)
    a = e1 * sA + e2 * v
    b = e1 * sB + e2

    ww2 = sp + row(ROW_NEG_EXP_TD)        # -exp(time_decay) precomputed
    p2 = jnp.maximum(ww2, k)
    e1b = jnp.exp(ww2 - p2)
    e2b = jnp.exp(k - p2)
    new_A = e1b * sA + e2b * v
    new_B = e1b * sB + e2b

    rwkv = r * a / b
    x = x + _mm(rwkv, wo_ref[...])

    # ---------------- channel-mix (ffn) ----------------
    xn2 = _layernorm(x, row(ROW_LN2W), row(ROW_LN2B))
    fxk = xn2 * row(ROW_FMK) + sffn * row(ROW_1M_FMK)
    fxr = xn2 * row(ROW_FMR) + sffn * row(ROW_1M_FMR)

    fr = _hardsigmoid(_mm(fxr, fwr_ref[...]))
    fk = _mm(fxk, fwk_ref[...])
    fk = jnp.square(jnp.maximum(fk, 0.0))
    x = x + fr * _mm(fk, fwv_ref[...])

    x_ref[...] = x
    ns_ref[0, :, :] = new_A               # state_A
    ns_ref[1, :, :] = new_B               # state_B
    ns_ref[2, :, :] = p2                  # state_p
    ns_ref[3, :, :] = xn                  # state_x  (TimeMix's post-ln1 input)
    ns_ref[4, :, :] = xn2                 # state_ffn (ChannelMix's post-ln2 input)


def rwkv_stack(x_emb, hidden_state, params):
    B, H = x_emb.shape
    L = params['att_wk'].shape[0]
    F = params['ffn_wk'].shape[2]

    def w_hh():
        return pl.BlockSpec((None, H, H), lambda l: (l, 0, 0))

    in_specs = [
        pl.BlockSpec((B, H), lambda l: (0, 0)),                    # embedded token
        pl.BlockSpec((5, None, B, H), lambda l: (0, l, 0, 0)),     # layer-l state
        pl.BlockSpec((None, N_VEC_ROWS, H), lambda l: (l, 0, 0)),  # packed vectors
        w_hh(), w_hh(), w_hh(), w_hh(),                            # att k/v/r/o
        pl.BlockSpec((None, H, F), lambda l: (l, 0, 0)),           # ffn key
        w_hh(),                                                    # ffn receptance
        pl.BlockSpec((None, F, H), lambda l: (l, 0, 0)),           # ffn value
    ]
    out_specs = (
        pl.BlockSpec((B, H), lambda l: (0, 0)),                    # resident x
        pl.BlockSpec((5, None, B, H), lambda l: (0, l, 0, 0)),     # new hidden slab
    )
    out_shape = (
        jax.ShapeDtypeStruct((B, H), jnp.float32),
        jax.ShapeDtypeStruct((5, L, B, H), jnp.float32),
    )
    fn = pl.pallas_call(
        _stack_kernel,
        out_shape=out_shape,
        grid_spec=pltpu.PrefetchScalarGridSpec(
            num_scalar_prefetch=0,
            grid=(L,),
            in_specs=in_specs,
            out_specs=out_specs,
        ),
        compiler_params=pltpu.CompilerParams(
            dimension_semantics=("arbitrary",),       # sequential over layers
            vmem_limit_bytes=32 * 1024 * 1024,        # raise further at real H
        ),
    )
    return fn(x_emb, hidden_state, params['vec'],
              params['att_wk'], params['att_wv'], params['att_wr'], params['att_wo'],
              params['ffn_wk'], params['ffn_wr'], params['ffn_wv'])


# ----------------------------------------------------------------------------
# Final LayerNorm + head projection, tiled over the vocab axis.
# ----------------------------------------------------------------------------
def _head_kernel(x_ref, lnw_ref, lnb_ref, w_ref, out_ref):
    xn = _layernorm(x_ref[...], lnw_ref[...], lnb_ref[...])
    out_ref[...] = _mm(xn, w_ref[...])


def rwkv_head(x, lnw, lnb, head_w, tile_v=256):
    B, H = x.shape
    V = head_w.shape[1]
    tile_v = min(tile_v, V)
    assert V % tile_v == 0
    return pl.pallas_call(
        _head_kernel,
        out_shape=jax.ShapeDtypeStruct((B, V), jnp.float32),
        grid_spec=pltpu.PrefetchScalarGridSpec(
            num_scalar_prefetch=0,
            grid=(V // tile_v,),
            in_specs=[
                pl.BlockSpec((B, H), lambda j: (0, 0)),
                pl.BlockSpec((1, H), lambda j: (0, 0)),
                pl.BlockSpec((1, H), lambda j: (0, 0)),
                pl.BlockSpec((H, tile_v), lambda j: (0, j)),
            ],
            out_specs=pl.BlockSpec((B, tile_v), lambda j: (0, j)),
        ),
        compiler_params=pltpu.CompilerParams(
            dimension_semantics=("parallel",),        # independent vocab tiles
            vmem_limit_bytes=32 * 1024 * 1024,
        ),
    )(x, lnw, lnb, head_w)


# ----------------------------------------------------------------------------
# Full model forward (only the embedding gather stays in plain JAX).
# ----------------------------------------------------------------------------
@jax.jit
def rwkv_v4_forward(input_token, hidden_state, params):
    # TODO(synk): nn.Embedding lookup (gather) has no clean tile-wise Pallas
    # expression at this size; it stays as a plain XLA gather.
    x_emb = params['emb'][input_token]                      # [B, H]
    x, new_hidden = rwkv_stack(x_emb, hidden_state, params)
    logits = rwkv_head(x, params['ln_out_w'], params['ln_out_b'], params['head_w'])
    return logits, new_hidden


# ----------------------------------------------------------------------------
# Pure-JAX reference (same math, same bf16 weights) for a correctness check
# ----------------------------------------------------------------------------
def _reference_forward(input_token, hidden_state, params):
    sA_all, sB_all, sp_all, sx_all, sffn_all = (hidden_state[i] for i in range(5))
    x = params['emb'][input_token]
    L = params['att_wk'].shape[0]
    news = []
    for i in range(L):
        vec = params['vec'][i]
        rr = lambda j: vec[j:j + 1, :]
        sA, sB, sp = sA_all[i], sB_all[i], sp_all[i]
        sx, sffn = sx_all[i], sffn_all[i]
        if i == 0:
            x = _layernorm(x, rr(ROW_LN0W), rr(ROW_LN0B))
        shortcut = x
        xn = _layernorm(x, rr(ROW_LN1W), rr(ROW_LN1B))
        xk = xn * rr(ROW_TMK) + sx * rr(ROW_1M_TMK)
        xv = xn * rr(ROW_TMV) + sx * rr(ROW_1M_TMV)
        xr = xn * rr(ROW_TMR) + sx * rr(ROW_1M_TMR)
        k = _mm(xk, params['att_wk'][i])
        v = _mm(xv, params['att_wv'][i])
        r = _hardsigmoid(_mm(xr, params['att_wr'][i]))
        ww = rr(ROW_TFIRST) + k
        p = jnp.maximum(sp, ww)
        a = jnp.exp(sp - p) * sA + jnp.exp(ww - p) * v
        b = jnp.exp(sp - p) * sB + jnp.exp(ww - p)
        ww2 = sp + rr(ROW_NEG_EXP_TD)
        p2 = jnp.maximum(ww2, k)
        nA = jnp.exp(ww2 - p2) * sA + jnp.exp(k - p2) * v
        nB = jnp.exp(ww2 - p2) * sB + jnp.exp(k - p2)
        x = shortcut + _mm(r * a / b, params['att_wo'][i])
        nx = xn
        shortcut = x
        xn2 = _layernorm(x, rr(ROW_LN2W), rr(ROW_LN2B))
        fxk = xn2 * rr(ROW_FMK) + sffn * rr(ROW_1M_FMK)
        fxr = xn2 * rr(ROW_FMR) + sffn * rr(ROW_1M_FMR)
        fr = _hardsigmoid(_mm(fxr, params['ffn_wr'][i]))
        fk = jnp.square(jnp.maximum(_mm(fxk, params['ffn_wk'][i]), 0.0))
        x = shortcut + fr * _mm(fk, params['ffn_wv'][i])
        news.append(jnp.stack([nA, nB, p2, nx, xn2], axis=0))
    new_hidden = jnp.transpose(jnp.stack(news, axis=0), (1, 0, 2, 3))
    xn = _layernorm(x, params['ln_out_w'], params['ln_out_b'])
    return _mm(xn, params['head_w']), new_hidden


# ----------------------------------------------------------------------------
# Deterministic parameter init (mirrors the torch module's parameter layout,
# pre-stacked per layer, weights stored in bf16, tiny vectors packed + folded).
# ----------------------------------------------------------------------------
def init_params(key, vocab, H, L, F):
    keys = jax.random.split(key, 22)
    scale_h = 1.0 / math.sqrt(H)
    scale_f = 1.0 / math.sqrt(F)

    def nrm(k, shape, s):
        return jax.random.normal(k, shape, jnp.float32) * s

    def uni(k, shape, lo=0.0, hi=1.0):
        return jax.random.uniform(k, shape, jnp.float32, lo, hi)

    ln0w = 1.0 + nrm(keys[0], (L, H), 0.1); ln0b = nrm(keys[1], (L, H), 0.1)
    ln1w = 1.0 + nrm(keys[2], (L, H), 0.1); ln1b = nrm(keys[3], (L, H), 0.1)
    ln2w = 1.0 + nrm(keys[4], (L, H), 0.1); ln2b = nrm(keys[5], (L, H), 0.1)
    time_decay = uni(keys[6], (L, H), -1.0, 1.0)
    time_first = math.log(0.3) + nrm(keys[7], (L, H), 0.1)
    tmk = uni(keys[8], (L, H)); tmv = uni(keys[9], (L, H)); tmr = uni(keys[10], (L, H))
    fmk = uni(keys[11], (L, H)); fmr = uni(keys[12], (L, H))

    # Packed per-layer constants, with -exp(time_decay) and (1 - mix) folded in.
    vec = jnp.stack([
        ln0w, ln0b, ln1w, ln1b, ln2w, ln2b,
        -jnp.exp(time_decay), time_first,
        tmk, 1.0 - tmk, tmv, 1.0 - tmv, tmr, 1.0 - tmr,
        fmk, 1.0 - fmk, fmr, 1.0 - fmr,
    ], axis=1).astype(jnp.float32)                         # [L, 18, H]

    def w(k, shape, s):
        return (jax.random.normal(k, shape, jnp.float32) * s).astype(BF16)

    return {
        'emb': nrm(keys[13], (vocab, H), 0.02),
        'vec': vec,
        'att_wk': w(keys[14], (L, H, H), scale_h),
        'att_wv': w(keys[15], (L, H, H), scale_h),
        'att_wr': w(keys[16], (L, H, H), scale_h),
        'att_wo': w(keys[17], (L, H, H), scale_h),
        'ffn_wk': w(keys[18], (L, H, F), scale_h),
        'ffn_wr': w(keys[19], (L, H, H), scale_h),
        'ffn_wv': w(keys[20], (L, F, H), scale_f),
        'ln_out_w': jnp.ones((1, H), jnp.float32),
        'ln_out_b': jnp.zeros((1, H), jnp.float32),
        'head_w': w(keys[21], (H, vocab), scale_h),
    }


if __name__ == "__main__":
    # TPU-friendly small shapes: batch=8 (full sublane), hidden=128, layers=4,
    # ffn=2*hidden=256, vocab=512 (2 head tiles), single-token decode step.
    B, H, L, F, V = 8, 128, 4, 256, 512
    key = jax.random.PRNGKey(0)
    k_param, k_tok = jax.random.split(key)
    params = init_params(k_param, V, H, L, F)
    tokens = jax.random.randint(k_tok, (B,), 0, V)

    # forward_initialzation: A=B=x=ffn=0, p=-1e30, stacked [5, L, B, H]
    hidden = jnp.stack([
        jnp.zeros((L, B, H), jnp.float32),
        jnp.zeros((L, B, H), jnp.float32),
        jnp.full((L, B, H), -1e30, jnp.float32),
        jnp.zeros((L, B, H), jnp.float32),
        jnp.zeros((L, B, H), jnp.float32),
    ])

    logits, new_hidden = rwkv_v4_forward(tokens, hidden, params)
    jax.block_until_ready((logits, new_hidden))

    ref_logits, ref_hidden = _reference_forward(tokens, hidden, params)
    assert logits.shape == (B, V) and new_hidden.shape == (5, L, B, H)
    assert jnp.allclose(logits, ref_logits, rtol=1e-2, atol=1e-2), \
        float(jnp.max(jnp.abs(logits - ref_logits)))
    assert jnp.allclose(new_hidden, ref_hidden, rtol=1e-2, atol=1e-2), \
        float(jnp.max(jnp.abs(new_hidden - ref_hidden)))

    print("KERNEL_OK")
</pallas_src>

<mosaic_0001>
module attributes {stable_mosaic.version = 11 : i64} {
  func.func @_head_kernel(%arg0: i32, %arg1: memref<8x128xf32, #tpu.memory_space<vmem>>, %arg2: memref<1x128xf32, #tpu.memory_space<vmem>>, %arg3: memref<1x128xf32, #tpu.memory_space<vmem>>, %arg4: memref<128x256xbf16, #tpu.memory_space<vmem>>, %arg5: memref<8x256xf32, #tpu.memory_space<vmem>>) attributes {dimension_semantics = [#tpu.dimension_semantics<parallel>], iteration_bounds = array<i64: 2>, scalar_prefetch = 0 : i64, scratch_operands = 0 : i64, tpu.core_type = #tpu.core_type<tc>, window_params = [{pipeline_mode = #tpu.pipeline_mode<synchronous>, transform_indices = @transform_0, window_bounds = array<i64: 8, 128>}, {pipeline_mode = #tpu.pipeline_mode<synchronous>, transform_indices = @transform_1, window_bounds = array<i64: 1, 128>}, {pipeline_mode = #tpu.pipeline_mode<synchronous>, transform_indices = @transform_2, window_bounds = array<i64: 1, 128>}, {transform_indices = @transform_3, window_bounds = array<i64: 128, 256>}, {transform_indices = @transform_4, window_bounds = array<i64: 8, 256>}]} {
    %c0 = arith.constant 0 : index
    %c0_0 = arith.constant 0 : index
    %0 = vector.load %arg1[%c0, %c0_0] : memref<8x128xf32, #tpu.memory_space<vmem>>, vector<8x128xf32>
    %c0_1 = arith.constant 0 : index
    %c0_2 = arith.constant 0 : index
    %1 = vector.load %arg2[%c0_1, %c0_2] : memref<1x128xf32, #tpu.memory_space<vmem>>, vector<1x128xf32>
    %c0_3 = arith.constant 0 : index
    %c0_4 = arith.constant 0 : index
    %2 = vector.load %arg3[%c0_3, %c0_4] : memref<1x128xf32, #tpu.memory_space<vmem>>, vector<1x128xf32>
    %cst = arith.constant dense<0.000000e+00> : vector<8xf32>
    %3 = vector.multi_reduction <add>, %0, %cst [1] : vector<8x128xf32> to vector<8xf32>
    %4 = vector.shape_cast %3 : vector<8xf32> to vector<8x1xf32>
    %cst_5 = arith.constant 1.280000e+02 : f32
    %5 = vector.broadcast %cst_5 : f32 to vector<8x1xf32>
    %6 = arith.divf %4, %5 : vector<8x1xf32>
    %7 = vector.broadcast %6 : vector<8x1xf32> to vector<8x128xf32>
    %8 = arith.subf %0, %7 : vector<8x128xf32>
    %9 = arith.mulf %8, %8 : vector<8x128xf32>
    %cst_6 = arith.constant dense<0.000000e+00> : vector<8xf32>
    %10 = vector.multi_reduction <add>, %9, %cst_6 [1] : vector<8x128xf32> to vector<8xf32>
    %11 = vector.shape_cast %10 : vector<8xf32> to vector<8x1xf32>
    %cst_7 = arith.constant 1.280000e+02 : f32
    %12 = vector.broadcast %cst_7 : f32 to vector<8x1xf32>
    %13 = arith.divf %11, %12 : vector<8x1xf32>
    %14 = vector.broadcast %6 : vector<8x1xf32> to vector<8x128xf32>
    %15 = arith.subf %0, %14 : vector<8x128xf32>
    %cst_8 = arith.constant 9.99999974E-6 : f32
    %16 = vector.broadcast %cst_8 : f32 to vector<8x1xf32>
    %17 = arith.addf %13, %16 : vector<8x1xf32>
    %18 = math.rsqrt %17 : vector<8x1xf32>
    %19 = vector.broadcast %18 : vector<8x1xf32> to vector<8x128xf32>
    %20 = arith.mulf %15, %19 : vector<8x128xf32>
    %21 = vector.broadcast %1 : vector<1x128xf32> to vector<8x128xf32>
    %22 = arith.mulf %20, %21 : vector<8x128xf32>
    %23 = vector.broadcast %2 : vector<1x128xf32> to vector<8x128xf32>
    %24 = arith.addf %22, %23 : vector<8x128xf32>
    %c0_9 = arith.constant 0 : index
    %c0_10 = arith.constant 0 : index
    %25 = vector.load %arg4[%c0_9, %c0_10] : memref<128x256xbf16, #tpu.memory_space<vmem>>, vector<128x256xbf16>
    %26 = arith.truncf %24 : vector<8x128xf32> to vector<8x128xbf16>
    %cst_11 = arith.constant dense<0.000000e+00> : vector<8x256xf32>
    %27 = tpu.matmul %26, %25, %cst_11 {dimension_numbers = #tpu.dot_dimension_numbers<[1], [0], [0], [1], [0, 0, 1, 1], [], []>} : vector<8x128xbf16>, vector<128x256xbf16>, vector<8x256xf32> -> vector<8x256xf32>
    %c0_12 = arith.constant 0 : index
    %c0_13 = arith.constant 0 : index
    %28 = vector.load %arg5[%c0_12, %c0_13] : memref<8x256xf32, #tpu.memory_space<vmem>>, vector<8x256xf32>
    tpu.vector_store %arg5[%c0_12, %c0_13], %27 {strides = array<i32>} : memref<8x256xf32, #tpu.memory_space<vmem>>, vector<8x256xf32>,
    return
  }
  func.func @transform_0(%arg0: i32) -> (i32, i32) {
    %c0_i32 = arith.constant 0 : i32
    %c0_i32_0 = arith.constant 0 : i32
    %c0_i32_1 = arith.constant 0 : i32
    return %c0_i32, %c0_i32_0 : i32, i32
  }
  func.func @transform_1(%arg0: i32) -> (i32, i32) {
    %c0_i32 = arith.constant 0 : i32
    %c0_i32_0 = arith.constant 0 : i32
    %c0_i32_1 = arith.constant 0 : i32
    return %c0_i32, %c0_i32_0 : i32, i32
  }
  func.func @transform_2(%arg0: i32) -> (i32, i32) {
    %c0_i32 = arith.constant 0 : i32
    %c0_i32_0 = arith.constant 0 : i32
    %c0_i32_1 = arith.constant 0 : i32
    return %c0_i32, %c0_i32_0 : i32, i32
  }
  func.func @transform_3(%arg0: i32) -> (i32, i32) {
    %c0_i32 = arith.constant 0 : i32
    %c0_i32_0 = arith.constant 0 : i32
    return %c0_i32, %arg0 : i32, i32
  }
  func.func @transform_4(%arg0: i32) -> (i32, i32) {
    %c0_i32 = arith.constant 0 : i32
    %c0_i32_0 = arith.constant 0 : i32
    return %c0_i32, %arg0 : i32, i32
  }
}

module attributes {stable_mosaic.version = 11 : i64} {
  func.func @_stack_kernel(%arg0: i32, %arg1: memref<8x128xf32, #tpu.memory_space<vmem>>, %arg2: memref<5x1x8x128xf32, #tpu.memory_space<vmem>>, %arg3: memref<1x18x128xf32, #tpu.memory_space<vmem>>, %arg4: memref<1x128x128xbf16, #tpu.memory_space<vmem>>, %arg5: memref<1x128x128xbf16, #tpu.memory_space<vmem>>, %arg6: memref<1x128x128xbf16, #tpu.memory_space<vmem>>, %arg7: memref<1x128x128xbf16, #tpu.memory_space<vmem>>, %arg8: memref<1x128x256xbf16, #tpu.memory_space<vmem>>, %arg9: memref<1x128x128xbf16, #tpu.memory_space<vmem>>, %arg10: memref<1x256x128xbf16, #tpu.memory_space<vmem>>, %arg11: memref<8x128xf32, #tpu.memory_space<vmem>>, %arg12: memref<5x1x8x128xf32, #tpu.memory_space<vmem>>) attributes {dimension_semantics = [#tpu.dimension_semantics<arbitrary>], iteration_bounds = array<i64: 4>, scalar_prefetch = 0 : i64, scratch_operands = 0 : i64, tpu.core_type = #tpu.core_type<tc>, window_params = [{pipeline_mode = #tpu.pipeline_mode<synchronous>, transform_indices = @transform_0, window_bounds = array<i64: 8, 128>}, {transform_indices = @transform_1, window_bounds = array<i64: 5, 1, 8, 128>}, {transform_indices = @transform_2, window_bounds = array<i64: 1, 18, 128>}, {transform_indices = @transform_3, window_bounds = array<i64: 1, 128, 128>}, {transform_indices = @transform_4, window_bounds = array<i64: 1, 128, 128>}, {transform_indices = @transform_5, window_bounds = array<i64: 1, 128, 128>}, {transform_indices = @transform_6, window_bounds = array<i64: 1, 128, 128>}, {transform_indices = @transform_7, window_bounds = array<i64: 1, 128, 256>}, {transform_indices = @transform_8, window_bounds = array<i64: 1, 128, 128>}, {transform_indices = @transform_9, window_bounds = array<i64: 1, 256, 128>}, {pipeline_mode = #tpu.pipeline_mode<synchronous>, transform_indices = @transform_10, window_bounds = array<i64: 8, 128>}, {transform_indices = @transform_11, window_bounds = array<i64: 5, 1, 8, 128>}]} {
    %c0 = arith.constant 0 : index
    %c0_0 = arith.constant 0 : index
    %c0_1 = arith.constant 0 : index
    %0 = vector.load %arg3[%c0, %c0_0, %c0_1] : memref<1x18x128xf32, #tpu.memory_space<vmem>>, vector<1x18x128xf32>
    %1 = vector.shape_cast %0 : vector<1x18x128xf32> to vector<18x128xf32>
    %c0_i32 = arith.constant 0 : i32
    %2 = arith.cmpi eq, %arg0, %c0_i32 : i32
    %3 = arith.extui %2 : i1 to i32
    %c0_i32_2 = arith.constant 0 : i32
    %4 = arith.cmpi ne, %3, %c0_i32_2 : i32
    scf.if %4 {
      %c0_89 = arith.constant 0 : index
      %c0_90 = arith.constant 0 : index
      %193 = vector.load %arg1[%c0_89, %c0_90] : memref<8x128xf32, #tpu.memory_space<vmem>>, vector<8x128xf32>
      %194 = vector.extract_strided_slice %1 {offsets = [0, 0], sizes = [1, 128], strides = [1, 1]} : vector<18x128xf32> to vector<1x128xf32>
      %195 = vector.extract_strided_slice %1 {offsets = [1, 0], sizes = [1, 128], strides = [1, 1]} : vector<18x128xf32> to vector<1x128xf32>
      %cst_91 = arith.constant dense<0.000000e+00> : vector<8xf32>
      %196 = vector.multi_reduction <add>, %193, %cst_91 [1] : vector<8x128xf32> to vector<8xf32>
      %197 = vector.shape_cast %196 : vector<8xf32> to vector<8x1xf32>
      %cst_92 = arith.constant 1.280000e+02 : f32
      %198 = vector.broadcast %cst_92 : f32 to vector<8x1xf32>
      %199 = arith.divf %197, %198 : vector<8x1xf32>
      %200 = vector.broadcast %199 : vector<8x1xf32> to vector<8x128xf32>
      %201 = arith.subf %193, %200 : vector<8x128xf32>
      %202 = arith.mulf %201, %201 : vector<8x128xf32>
      %cst_93 = arith.constant dense<0.000000e+00> : vector<8xf32>
      %203 = vector.multi_reduction <add>, %202, %cst_93 [1] : vector<8x128xf32> to vector<8xf32>
      %204 = vector.shape_cast %203 : vector<8xf32> to vector<8x1xf32>
      %cst_94 = arith.constant 1.280000e+02 : f32
      %205 = vector.broadcast %cst_94 : f32 to vector<8x1xf32>
      %206 = arith.divf %204, %205 : vector<8x1xf32>
      %207 = vector.broadcast %199 : vector<8x1xf32> to vector<8x128xf32>
      %208 = arith.subf %193, %207 : vector<8x128xf32>
      %cst_95 = arith.constant 9.99999974E-6 : f32
      %209 = vector.broadcast %cst_95 : f32 to vector<8x1xf32>
      %210 = arith.addf %206, %209 : vector<8x1xf32>
      %211 = math.rsqrt %210 : vector<8x1xf32>
      %212 = vector.broadcast %211 : vector<8x1xf32> to vector<8x128xf32>
      %213 = arith.mulf %208, %212 : vector<8x128xf32>
      %214 = vector.broadcast %194 : vector<1x128xf32> to vector<8x128xf32>
      %215 = arith.mulf %213, %214 : vector<8x128xf32>
      %216 = vector.broadcast %195 : vector<1x128xf32> to vector<8x128xf32>
      %217 = arith.addf %215, %216 : vector<8x128xf32>
      %c0_96 = arith.constant 0 : index
      %c0_97 = arith.constant 0 : index
      %218 = vector.load %arg11[%c0_96, %c0_97] : memref<8x128xf32, #tpu.memory_space<vmem>>, vector<8x128xf32>
      tpu.vector_store %arg11[%c0_96, %c0_97], %217 {strides = array<i32>} : memref<8x128xf32, #tpu.memory_space<vmem>>, vector<8x128xf32>,
    } else {
    }
    %c0_3 = arith.constant 0 : index
    %c0_4 = arith.constant 0 : index
    %5 = vector.load %arg11[%c0_3, %c0_4] : memref<8x128xf32, #tpu.memory_space<vmem>>, vector<8x128xf32>
    %c0_5 = arith.constant 0 : index
    %c0_6 = arith.constant 0 : index
    %c0_7 = arith.constant 0 : index
    %c0_8 = arith.constant 0 : index
    %6 = vector.load %arg2[%c0_5, %c0_6, %c0_7, %c0_8] : memref<5x1x8x128xf32, #tpu.memory_space<vmem>>, vector<1x1x8x128xf32>
    %7 = vector.shape_cast %6 : vector<1x1x8x128xf32> to vector<8x128xf32>
    %c1 = arith.constant 1 : index
    %c0_9 = arith.constant 0 : index
    %c0_10 = arith.constant 0 : index
    %c0_11 = arith.constant 0 : index
    %8 = vector.load %arg2[%c1, %c0_9, %c0_10, %c0_11] : memref<5x1x8x128xf32, #tpu.memory_space<vmem>>, vector<1x1x8x128xf32>
    %9 = vector.shape_cast %8 : vector<1x1x8x128xf32> to vector<8x128xf32>
    %c2 = arith.constant 2 : index
    %c0_12 = arith.constant 0 : index
    %c0_13 = arith.constant 0 : index
    %c0_14 = arith.constant 0 : index
    %10 = vector.load %arg2[%c2, %c0_12, %c0_13, %c0_14] : memref<5x1x8x128xf32, #tpu.memory_space<vmem>>, vector<1x1x8x128xf32>
    %11 = vector.shape_cast %10 : vector<1x1x8x128xf32> to vector<8x128xf32>
    %c3 = arith.constant 3 : index
    %c0_15 = arith.constant 0 : index
    %c0_16 = arith.constant 0 : index
    %c0_17 = arith.constant 0 : index
    %12 = vector.load %arg2[%c3, %c0_15, %c0_16, %c0_17] : memref<5x1x8x128xf32, #tpu.memory_space<vmem>>, vector<1x1x8x128xf32>
    %13 = vector.shape_cast %12 : vector<1x1x8x128xf32> to vector<8x128xf32>
    %c4 = arith.constant 4 : index
    %c0_18 = arith.constant 0 : index
    %c0_19 = arith.constant 0 : index
    %c0_20 = arith.constant 0 : index
    %14 = vector.load %arg2[%c4, %c0_18, %c0_19, %c0_20] : memref<5x1x8x128xf32, #tpu.memory_space<vmem>>, vector<1x1x8x128xf32>
    %15 = vector.shape_cast %14 : vector<1x1x8x128xf32> to vector<8x128xf32>
    %16 = vector.extract_strided_slice %1 {offsets = [2, 0], sizes = [1, 128], strides = [1, 1]} : vector<18x128xf32> to vector<1x128xf32>
    %17 = vector.extract_strided_slice %1 {offsets = [3, 0], sizes = [1, 128], strides = [1, 1]} : vector<18x128xf32> to vector<1x128xf32>
    %cst = arith.constant dense<0.000000e+00> : vector<8xf32>
    %18 = vector.multi_reduction <add>, %5, %cst [1] : vector<8x128xf32> to vector<8xf32>
    %19 = vector.shape_cast %18 : vector<8xf32> to vector<8x1xf32>
    %cst_21 = arith.constant 1.280000e+02 : f32
    %20 = vector.broadcast %cst_21 : f32 to vector<8x1xf32>
    %21 = arith.divf %19, %20 : vector<8x1xf32>
    %22 = vector.broadcast %21 : vector<8x1xf32> to vector<8x128xf32>
    %23 = arith.subf %5, %22 : vector<8x128xf32>
    %24 = arith.mulf %23, %23 : vector<8x128xf32>
    %cst_22 = arith.constant dense<0.000000e+00> : vector<8xf32>
    %25 = vector.multi_reduction <add>, %24, %cst_22 [1] : vector<8x128xf32> to vector<8xf32>
    %26 = vector.shape_cast %25 : vector<8xf32> to vector<8x1xf32>
    %cst_23 = arith.constant 1.280000e+02 : f32
    %27 = vector.broadcast %cst_23 : f32 to vector<8x1xf32>
    %28 = arith.divf %26, %27 : vector<8x1xf32>
    %29 = vector.broadcast %21 : vector<8x1xf32> to vector<8x128xf32>
    %30 = arith.subf %5, %29 : vector<8x128xf32>
    %cst_24 = arith.constant 9.99999974E-6 : f32
    %31 = vector.broadcast %cst_24 : f32 to vector<8x1xf32>
    %32 = arith.addf %28, %31 : vector<8x1xf32>
    %33 = math.rsqrt %32 : vector<8x1xf32>
    %34 = vector.broadcast %33 : vector<8x1xf32> to vector<8x128xf32>
    %35 = arith.mulf %30, %34 : vector<8x128xf32>
    %36 = vector.broadcast %16 : vector<1x128xf32> to vector<8x128xf32>
    %37 = arith.mulf %35, %36 : vector<8x128xf32>
    %38 = vector.broadcast %17 : vector<1x128xf32> to vector<8x128xf32>
    %39 = arith.addf %37, %38 : vector<8x128xf32>
    %40 = vector.extract_strided_slice %1 {offsets = [8, 0], sizes = [1, 128], strides = [1, 1]} : vector<18x128xf32> to vector<1x128xf32>
    %41 = vector.broadcast %40 : vector<1x128xf32> to vector<8x128xf32>
    %42 = arith.mulf %39, %41 : vector<8x128xf32>
    %43 = vector.extract_strided_slice %1 {offsets = [9, 0], sizes = [1, 128], strides = [1, 1]} : vector<18x128xf32> to vector<1x128xf32>
    %44 = vector.broadcast %43 : vector<1x128xf32> to vector<8x128xf32>
    %45 = arith.mulf %13, %44 : vector<8x128xf32>
    %46 = arith.addf %42, %45 : vector<8x128xf32>
    %47 = vector.extract_strided_slice %1 {offsets = [10, 0], sizes = [1, 128], strides = [1, 1]} : vector<18x128xf32> to vector<1x128xf32>
    %48 = vector.broadcast %47 : vector<1x128xf32> to vector<8x128xf32>
    %49 = arith.mulf %39, %48 : vector<8x128xf32>
    %50 = vector.extract_strided_slice %1 {offsets = [11, 0], sizes = [1, 128], strides = [1, 1]} : vector<18x128xf32> to vector<1x128xf32>
    %51 = vector.broadcast %50 : vector<1x128xf32> to vector<8x128xf32>
    %52 = arith.mulf %13, %51 : vector<8x128xf32>
    %53 = arith.addf %49, %52 : vector<8x128xf32>
    %54 = vector.extract_strided_slice %1 {offsets = [12, 0], sizes = [1, 128], strides = [1, 1]} : vector<18x128xf32> to vector<1x128xf32>
    %55 = vector.broadcast %54 : vector<1x128xf32> to vector<8x128xf32>
    %56 = arith.mulf %39, %55 : vector<8x128xf32>
    %57 = vector.extract_strided_slice %1 {offsets = [13, 0], sizes = [1, 128], strides = [1, 1]} : vector<18x128xf32> to vector<1x128xf32>
    %58 = vector.broadcast %57 : vector<1x128xf32> to vector<8x128xf32>
    %59 = arith.mulf %13, %58 : vector<8x128xf32>
    %60 = arith.addf %56, %59 : vector<8x128xf32>
    %c0_25 = arith.constant 0 : index
    %c0_26 = arith.constant 0 : index
    %c0_27 = arith.constant 0 : index
    %61 = vector.load %arg4[%c0_25, %c0_26, %c0_27] : memref<1x128x128xbf16, #tpu.memory_space<vmem>>, vector<1x128x128xbf16>
    %62 = vector.shape_cast %61 : vector<1x128x128xbf16> to vector<128x128xbf16>
    %63 = arith.truncf %46 : vector<8x128xf32> to vector<8x128xbf16>
    %cst_28 = arith.constant dense<0.000000e+00> : vector<8x128xf32>
    %64 = tpu.matmul %63, %62, %cst_28 {dimension_numbers = #tpu.dot_dimension_numbers<[1], [0], [0], [1], [0, 0, 1, 1], [], []>} : vector<8x128xbf16>, vector<128x128xbf16>, vector<8x128xf32> -> vector<8x128xf32>
    %c0_29 = arith.constant 0 : index
    %c0_30 = arith.constant 0 : index
    %c0_31 = arith.constant 0 : index
    %65 = vector.load %arg5[%c0_29, %c0_30, %c0_31] : memref<1x128x128xbf16, #tpu.memory_space<vmem>>, vector<1x128x128xbf16>
    %66 = vector.shape_cast %65 : vector<1x128x128xbf16> to vector<128x128xbf16>
    %67 = arith.truncf %53 : vector<8x128xf32> to vector<8x128xbf16>
    %cst_32 = arith.constant dense<0.000000e+00> : vector<8x128xf32>
    %68 = tpu.matmul %67, %66, %cst_32 {dimension_numbers = #tpu.dot_dimension_numbers<[1], [0], [0], [1], [0, 0, 1, 1], [], []>} : vector<8x128xbf16>, vector<128x128xbf16>, vector<8x128xf32> -> vector<8x128xf32>
    %c0_33 = arith.constant 0 : index
    %c0_34 = arith.constant 0 : index
    %c0_35 = arith.constant 0 : index
    %69 = vector.load %arg6[%c0_33, %c0_34, %c0_35] : memref<1x128x128xbf16, #tpu.memory_space<vmem>>, vector<1x128x128xbf16>
    %70 = vector.shape_cast %69 : vector<1x128x128xbf16> to vector<128x128xbf16>
    %71 = arith.truncf %60 : vector<8x128xf32> to vector<8x128xbf16>
    %cst_36 = arith.constant dense<0.000000e+00> : vector<8x128xf32>
    %72 = tpu.matmul %71, %70, %cst_36 {dimension_numbers = #tpu.dot_dimension_numbers<[1], [0], [0], [1], [0, 0, 1, 1], [], []>} : vector<8x128xbf16>, vector<128x128xbf16>, vector<8x128xf32> -> vector<8x128xf32>
    %cst_37 = arith.constant 6.000000e+00 : f32
    %73 = vector.broadcast %cst_37 : f32 to vector<8x128xf32>
    %74 = arith.divf %72, %73 : vector<8x128xf32>
    %cst_38 = arith.constant 5.000000e-01 : f32
    %75 = vector.broadcast %cst_38 : f32 to vector<8x128xf32>
    %76 = arith.addf %74, %75 : vector<8x128xf32>
    %cst_39 = arith.constant 0.000000e+00 : f32
    %cst_40 = arith.constant 1.000000e+00 : f32
    %77 = vector.broadcast %cst_39 : f32 to vector<8x128xf32>
    %78 = arith.maximumf %77, %76 : vector<8x128xf32>
    %79 = vector.broadcast %cst_40 : f32 to vector<8x128xf32>
    %80 = arith.minimumf %79, %78 : vector<8x128xf32>
    %81 = vector.extract_strided_slice %1 {offsets = [7, 0], sizes = [1, 128], strides = [1, 1]} : vector<18x128xf32> to vector<1x128xf32>
    %82 = vector.broadcast %81 : vector<1x128xf32> to vector<8x128xf32>
    %83 = arith.addf %82, %64 : vector<8x128xf32>
    %84 = arith.maximumf %11, %83 : vector<8x128xf32>
    %85 = arith.subf %11, %84 : vector<8x128xf32>
    %86 = math.exp %85 : vector<8x128xf32>
    %87 = arith.subf %83, %84 : vector<8x128xf32>
    %88 = math.exp %87 : vector<8x128xf32>
    %89 = arith.mulf %86, %7 : vector<8x128xf32>
    %90 = arith.mulf %88, %68 : vector<8x128xf32>
    %91 = arith.addf %89, %90 : vector<8x128xf32>
    %92 = arith.mulf %86, %9 : vector<8x128xf32>
    %93 = arith.addf %92, %88 : vector<8x128xf32>
    %94 = vector.extract_strided_slice %1 {offsets = [6, 0], sizes = [1, 128], strides = [1, 1]} : vector<18x128xf32> to vector<1x128xf32>
    %95 = vector.broadcast %94 : vector<1x128xf32> to vector<8x128xf32>
    %96 = arith.addf %11, %95 : vector<8x128xf32>
    %97 = arith.maximumf %96, %64 : vector<8x128xf32>
    %98 = arith.subf %96, %97 : vector<8x128xf32>
    %99 = math.exp %98 : vector<8x128xf32>
    %100 = arith.subf %64, %97 : vector<8x128xf32>
    %101 = math.exp %100 : vector<8x128xf32>
    %102 = arith.mulf %99, %7 : vector<8x128xf32>
    %103 = arith.mulf %101, %68 : vector<8x128xf32>
    %104 = arith.addf %102, %103 : vector<8x128xf32>
    %105 = arith.mulf %99, %9 : vector<8x128xf32>
    %106 = arith.addf %105, %101 : vector<8x128xf32>
    %107 = arith.mulf %80, %91 : vector<8x128xf32>
    %108 = arith.divf %107, %93 : vector<8x128xf32>
    %c0_41 = arith.constant 0 : index
    %c0_42 = arith.constant 0 : index
    %c0_43 = arith.constant 0 : index
    %109 = vector.load %arg7[%c0_41, %c0_42, %c0_43] : memref<1x128x128xbf16, #tpu.memory_space<vmem>>, vector<1x128x128xbf16>
    %110 = vector.shape_cast %109 : vector<1x128x128xbf16> to vector<128x128xbf16>
    %111 = arith.truncf %108 : vector<8x128xf32> to vector<8x128xbf16>
    %cst_44 = arith.constant dense<0.000000e+00> : vector<8x128xf32>
    %112 = tpu.matmul %111, %110, %cst_44 {dimension_numbers = #tpu.dot_dimension_numbers<[1], [0], [0], [1], [0, 0, 1, 1], [], []>} : vector<8x128xbf16>, vector<128x128xbf16>, vector<8x128xf32> -> vector<8x128xf32>
    %113 = arith.addf %5, %112 : vector<8x128xf32>
    %114 = vector.extract_strided_slice %1 {offsets = [4, 0], sizes = [1, 128], strides = [1, 1]} : vector<18x128xf32> to vector<1x128xf32>
    %115 = vector.extract_strided_slice %1 {offsets = [5, 0], sizes = [1, 128], strides = [1, 1]} : vector<18x128xf32> to vector<1x128xf32>
    %cst_45 = arith.constant dense<0.000000e+00> : vector<8xf32>
    %116 = vector.multi_reduction <add>, %113, %cst_45 [1] : vector<8x128xf32> to vector<8xf32>
    %117 = vector.shape_cast %116 : vector<8xf32> to vector<8x1xf32>
    %cst_46 = arith.constant 1.280000e+02 : f32
    %118 = vector.broadcast %cst_46 : f32 to vector<8x1xf32>
    %119 = arith.divf %117, %118 : vector<8x1xf32>
    %120 = vector.broadcast %119 : vector<8x1xf32> to vector<8x128xf32>
    %121 = arith.subf %113, %120 : vector<8x128xf32>
    %122 = arith.mulf %121, %121 : vector<8x128xf32>
    %cst_47 = arith.constant dense<0.000000e+00> : vector<8xf32>
    %123 = vector.multi_reduction <add>, %122, %cst_47 [1] : vector<8x128xf32> to vector<8xf32>
    %124 = vector.shape_cast %123 : vector<8xf32> to vector<8x1xf32>
    %cst_48 = arith.constant 1.280000e+02 : f32
    %125 = vector.broadcast %cst_48 : f32 to vector<8x1xf32>
    %126 = arith.divf %124, %125 : vector<8x1xf32>
    %127 = vector.broadcast %119 : vector<8x1xf32> to vector<8x128xf32>
    %128 = arith.subf %113, %127 : vector<8x128xf32>
    %cst_49 = arith.constant 9.99999974E-6 : f32
    %129 = vector.broadcast %cst_49 : f32 to vector<8x1xf32>
    %130 = arith.addf %126, %129 : vector<8x1xf32>
    %131 = math.rsqrt %130 : vector<8x1xf32>
    %132 = vector.broadcast %131 : vector<8x1xf32> to vector<8x128xf32>
    %133 = arith.mulf %128, %132 : vector<8x128xf32>
    %134 = vector.broadcast %114 : vector<1x128xf32> to vector<8x128xf32>
    %135 = arith.mulf %133, %134 : vector<8x128xf32>
    %136 = vector.broadcast %115 : vector<1x128xf32> to vector<8x128xf32>
    %137 = arith.addf %135, %136 : vector<8x128xf32>
    %138 = vector.extract_strided_slice %1 {offsets = [14, 0], sizes = [1, 128], strides = [1, 1]} : vector<18x128xf32> to vector<1x128xf32>
    %139 = vector.broadcast %138 : vector<1x128xf32> to vector<8x128xf32>
    %140 = arith.mulf %137, %139 : vector<8x128xf32>
    %141 = vector.extract_strided_slice %1 {offsets = [15, 0], sizes = [1, 128], strides = [1, 1]} : vector<18x128xf32> to vector<1x128xf32>
    %142 = vector.broadcast %141 : vector<1x128xf32> to vector<8x128xf32>
    %143 = arith.mulf %15, %142 : vector<8x128xf32>
    %144 = arith.addf %140, %143 : vector<8x128xf32>
    %145 = vector.extract_strided_slice %1 {offsets = [16, 0], sizes = [1, 128], strides = [1, 1]} : vector<18x128xf32> to vector<1x128xf32>
    %146 = vector.broadcast %145 : vector<1x128xf32> to vector<8x128xf32>
    %147 = arith.mulf %137, %146 : vector<8x128xf32>
    %148 = vector.extract_strided_slice %1 {offsets = [17, 0], sizes = [1, 128], strides = [1, 1]} : vector<18x128xf32> to vector<1x128xf32>
    %149 = vector.broadcast %148 : vector<1x128xf32> to vector<8x128xf32>
    %150 = arith.mulf %15, %149 : vector<8x128xf32>
    %151 = arith.addf %147, %150 : vector<8x128xf32>
    %c0_50 = arith.constant 0 : index
    %c0_51 = arith.constant 0 : index
    %c0_52 = arith.constant 0 : index
    %152 = vector.load %arg9[%c0_50, %c0_51, %c0_52] : memref<1x128x128xbf16, #tpu.memory_space<vmem>>, vector<1x128x128xbf16>
    %153 = vector.shape_cast %152 : vector<1x128x128xbf16> to vector<128x128xbf16>
    %154 = arith.truncf %151 : vector<8x128xf32> to vector<8x128xbf16>
    %cst_53 = arith.constant dense<0.000000e+00> : vector<8x128xf32>
    %155 = tpu.matmul %154, %153, %cst_53 {dimension_numbers = #tpu.dot_dimension_numbers<[1], [0], [0], [1], [0, 0, 1, 1], [], []>} : vector<8x128xbf16>, vector<128x128xbf16>, vector<8x128xf32> -> vector<8x128xf32>
    %cst_54 = arith.constant 6.000000e+00 : f32
    %156 = vector.broadcast %cst_54 : f32 to vector<8x128xf32>
    %157 = arith.divf %155, %156 : vector<8x128xf32>
    %cst_55 = arith.constant 5.000000e-01 : f32
    %158 = vector.broadcast %cst_55 : f32 to vector<8x128xf32>
    %159 = arith.addf %157, %158 : vector<8x128xf32>
    %cst_56 = arith.constant 0.000000e+00 : f32
    %cst_57 = arith.constant 1.000000e+00 : f32
    %160 = vector.broadcast %cst_56 : f32 to vector<8x128xf32>
    %161 = arith.maximumf %160, %159 : vector<8x128xf32>
    %162 = vector.broadcast %cst_57 : f32 to vector<8x128xf32>
    %163 = arith.minimumf %162, %161 : vector<8x128xf32>
    %c0_58 = arith.constant 0 : index
    %c0_59 = arith.constant 0 : index
    %c0_60 = arith.constant 0 : index
    %164 = vector.load %arg8[%c0_58, %c0_59, %c0_60] : memref<1x128x256xbf16, #tpu.memory_space<vmem>>, vector<1x128x256xbf16>
    %165 = vector.shape_cast %164 : vector<1x128x256xbf16> to vector<128x256xbf16>
    %166 = arith.truncf %144 : vector<8x128xf32> to vector<8x128xbf16>
    %cst_61 = arith.constant dense<0.000000e+00> : vector<8x256xf32>
    %167 = tpu.matmul %166, %165, %cst_61 {dimension_numbers = #tpu.dot_dimension_numbers<[1], [0], [0], [1], [0, 0, 1, 1], [], []>} : vector<8x128xbf16>, vector<128x256xbf16>, vector<8x256xf32> -> vector<8x256xf32>
    %cst_62 = arith.constant 0.000000e+00 : f32
    %168 = vector.broadcast %cst_62 : f32 to vector<8x256xf32>
    %169 = arith.maximumf %167, %168 : vector<8x256xf32>
    %170 = arith.mulf %169, %169 : vector<8x256xf32>
    %c0_63 = arith.constant 0 : index
    %c0_64 = arith.constant 0 : index
    %c0_65 = arith.constant 0 : index
    %171 = vector.load %arg10[%c0_63, %c0_64, %c0_65] : memref<1x256x128xbf16, #tpu.memory_space<vmem>>, vector<1x256x128xbf16>
    %172 = vector.shape_cast %171 : vector<1x256x128xbf16> to vector<256x128xbf16>
    %173 = arith.truncf %170 : vector<8x256xf32> to vector<8x256xbf16>
    %cst_66 = arith.constant dense<0.000000e+00> : vector<8x128xf32>
    %174 = tpu.matmul %173, %172, %cst_66 {dimension_numbers = #tpu.dot_dimension_numbers<[1], [0], [0], [1], [0, 0, 1, 1], [], []>} : vector<8x256xbf16>, vector<256x128xbf16>, vector<8x128xf32> -> vector<8x128xf32>
    %175 = arith.mulf %163, %174 : vector<8x128xf32>
    %176 = arith.addf %113, %175 : vector<8x128xf32>
    %c0_67 = arith.constant 0 : index
    %c0_68 = arith.constant 0 : index
    %177 = vector.load %arg11[%c0_67, %c0_68] : memref<8x128xf32, #tpu.memory_space<vmem>>, vector<8x128xf32>
    tpu.vector_store %arg11[%c0_67, %c0_68], %176 {strides = array<i32>} : memref<8x128xf32, #tpu.memory_space<vmem>>, vector<8x128xf32>,
    %c0_69 = arith.constant 0 : index
    %c0_70 = arith.constant 0 : index
    %c0_71 = arith.constant 0 : index
    %c0_72 = arith.constant 0 : index
    %178 = vector.load %arg12[%c0_69, %c0_70, %c0_71, %c0_72] : memref<5x1x8x128xf32, #tpu.memory_space<vmem>>, vector<1x1x8x128xf32>
    %179 = vector.shape_cast %178 : vector<1x1x8x128xf32> to vector<8x128xf32>
    %180 = vector.shape_cast %104 : vector<8x128xf32> to vector<1x1x8x128xf32>
    tpu.vector_store %arg12[%c0_69, %c0_70, %c0_71, %c0_72], %180 {strides = array<i32>} : memref<5x1x8x128xf32, #tpu.memory_space<vmem>>, vector<1x1x8x128xf32>,
    %c1_73 = arith.constant 1 : index
    %c0_74 = arith.constant 0 : index
    %c0_75 = arith.constant 0 : index
    %c0_76 = arith.constant 0 : index
    %181 = vector.load %arg12[%c1_73, %c0_74, %c0_75, %c0_76] : memref<5x1x8x128xf32, #tpu.memory_space<vmem>>, vector<1x1x8x128xf32>
    %182 = vector.shape_cast %181 : vector<1x1x8x128xf32> to vector<8x128xf32>
    %183 = vector.shape_cast %106 : vector<8x128xf32> to vector<1x1x8x128xf32>
    tpu.vector_store %arg12[%c1_73, %c0_74, %c0_75, %c0_76], %183 {strides = array<i32>} : memref<5x1x8x128xf32, #tpu.memory_space<vmem>>, vector<1x1x8x128xf32>,
    %c2_77 = arith.constant 2 : index
    %c0_78 = arith.constant 0 : index
    %c0_79 = arith.constant 0 : index
    %c0_80 = arith.constant 0 : index
    %184 = vector.load %arg12[%c2_77, %c0_78, %c0_79, %c0_80] : memref<5x1x8x128xf32, #tpu.memory_space<vmem>>, vector<1x1x8x128xf32>
    %185 = vector.shape_cast %184 : vector<1x1x8x128xf32> to vector<8x128xf32>
    %186 = vector.shape_cast %97 : vector<8x128xf32> to vector<1x1x8x128xf32>
    tpu.vector_store %arg12[%c2_77, %c0_78, %c0_79, %c0_80], %186 {strides = array<i32>} : memref<5x1x8x128xf32, #tpu.memory_space<vmem>>, vector<1x1x8x128xf32>,
    %c3_81 = arith.constant 3 : index
    %c0_82 = arith.constant 0 : index
    %c0_83 = arith.constant 0 : index
    %c0_84 = arith.constant 0 : index
    %187 = vector.load %arg12[%c3_81, %c0_82, %c0_83, %c0_84] : memref<5x1x8x128xf32, #tpu.memory_space<vmem>>, vector<1x1x8x128xf32>
    %188 = vector.shape_cast %187 : vector<1x1x8x128xf32> to vector<8x128xf32>
    %189 = vector.shape_cast %39 : vector<8x128xf32> to vector<1x1x8x128xf32>
    tpu.vector_store %arg12[%c3_81, %c0_82, %c0_83, %c0_84], %189 {strides = array<i32>} : memref<5x1x8x128xf32, #tpu.memory_space<vmem>>, vector<1x1x8x128xf32>,
    %c4_85 = arith.constant 4 : index
    %c0_86 = arith.constant 0 : index
    %c0_87 = arith.constant 0 : index
    %c0_88 = arith.constant 0 : index
    %190 = vector.load %arg12[%c4_85, %c0_86, %c0_87, %c0_88] : memref<5x1x8x128xf32, #tpu.memory_space<vmem>>, vector<1x1x8x128xf32>
    %191 = vector.shape_cast %190 : vector<1x1x8x128xf32> to vector<8x128xf32>
    %192 = vector.shape_cast %137 : vector<8x128xf32> to vector<1x1x8x128xf32>
    tpu.vector_store %arg12[%c4_85, %c0_86, %c0_87, %c0_88], %192 {strides = array<i32>} : memref<5x1x8x128xf32, #tpu.memory_space<vmem>>, vector<1x1x8x128xf32>,
    return
  }
  func.func @transform_0(%arg0: i32) -> (i32, i32) {
    %c0_i32 = arith.constant 0 : i32
    %c0_i32_0 = arith.constant 0 : i32
    %c0_i32_1 = arith.constant 0 : i32
    return %c0_i32, %c0_i32_0 : i32, i32
  }
  func.func @transform_1(%arg0: i32) -> (i32, i32, i32, i32) {
    %c0_i32 = arith.constant 0 : i32
    %c0_i32_0 = arith.constant 0 : i32
    %c0_i32_1 = arith.constant 0 : i32
    %c0_i32_2 = arith.constant 0 : i32
    return %c0_i32, %arg0, %c0_i32_0, %c0_i32_1 : i32, i32, i32, i32
  }
  func.func @transform_2(%arg0: i32) -> (i32, i32, i32) {
    %c0_i32 = arith.constant 0 : i32
    %c0_i32_0 = arith.constant 0 : i32
    %c0_i32_1 = arith.constant 0 : i32
    return %arg0, %c0_i32, %c0_i32_0 : i32, i32, i32
  }
  func.func @transform_3(%arg0: i32) -> (i32, i32, i32) {
    %c0_i32 = arith.constant 0 : i32
    %c0_i32_0 = arith.constant 0 : i32
    %c0_i32_1 = arith.constant 0 : i32
    return %arg0, %c0_i32, %c0_i32_0 : i32, i32, i32
  }
  func.func @transform_4(%arg0: i32) -> (i32, i32, i32) {
    %c0_i32 = arith.constant 0 : i32
    %c0_i32_0 = arith.constant 0 : i32
    %c0_i32_1 = arith.constant 0 : i32
    return %arg0, %c0_i32, %c0_i32_0 : i32, i32, i32
  }
  func.func @transform_5(%arg0: i32) -> (i32, i32, i32) {
    %c0_i32 = arith.constant 0 : i32
    %c0_i32_0 = arith.constant 0 : i32
    %c0_i32_1 = arith.constant 0 : i32
    return %arg0, %c0_i32, %c0_i32_0 : i32, i32, i32
  }
  func.func @transform_6(%arg0: i32) -> (i32, i32, i32) {
    %c0_i32 = arith.constant 0 : i32
    %c0_i32_0 = arith.constant 0 : i32
    %c0_i32_1 = arith.constant 0 : i32
    return %arg0, %c0_i32, %c0_i32_0 : i32, i32, i32
  }
  func.func @transform_7(%arg0: i32) -> (i32, i32, i32) {
    %c0_i32 = arith.constant 0 : i32
    %c0_i32_0 = arith.constant 0 : i32
    %c0_i32_1 = arith.constant 0 : i32
    return %arg0, %c0_i32, %c0_i32_0 : i32, i32, i32
  }
  func.func @transform_8(%arg0: i32) -> (i32, i32, i32) {
    %c0_i32 = arith.constant 0 : i32
    %c0_i32_0 = arith.constant 0 : i32
    %c0_i32_1 = arith.constant 0 : i32
    return %arg0, %c0_i32, %c0_i32_0 : i32, i32, i32
  }
  func.func @transform_9(%arg0: i32) -> (i32, i32, i32) {
    %c0_i32 = arith.constant 0 : i32
    %c0_i32_0 = arith.constant 0 : i32
    %c0_i32_1 = arith.constant 0 : i32
    return %arg0, %c0_i32, %c0_i32_0 : i32, i32, i32
  }
  func.func @transform_10(%arg0: i32) -> (i32, i32) {
    %c0_i32 = arith.constant 0 : i32
    %c0_i32_0 = arith.constant 0 : i32
    %c0_i32_1 = arith.constant 0 : i32
    return %c0_i32, %c0_i32_0 : i32, i32
  }
  func.func @transform_11(%arg0: i32) -> (i32, i32, i32, i32) {
    %c0_i32 = arith.constant 0 : i32
    %c0_i32_0 = arith.constant 0 : i32
    %c0_i32_1 = arith.constant 0 : i32
    %c0_i32_2 = arith.constant 0 : i32
    return %c0_i32, %arg0, %c0_i32_0, %c0_i32_1 : i32, i32, i32, i32
  }
}

</mosaic_0001>

<bundles_post_ra>
// kernel: rwkv_v4_forward.3
= control target key start
LH: loop header
LB: loop body
LE: loop exit
PB: predicated region body
PF: predicated region fallthrough
CT: control target
= control target key end

     0   :  { %9 = vsyncpa [#allocation4], 0  ;;  %s889_s0 = inlined_call_operand.vmem [shape: f32[8,128], index: 0, kind: input, shape index: {}]   ;;  %s890_s1 = inlined_call_operand.vmem [shape: f32[1,128], index: 1, kind: input, shape index: {}]   ;;  %s891_s2 = inlined_call_operand.vmem [shape: f32[1,128], index: 2, kind: input, shape index: {}]   ;;  %s892_s3 = inlined_call_operand.vmem [shape: bf16[128,512], index: 3, kind: input, shape index: {}]   ;;  %s893_s4 = inlined_call_operand.hbm [shape: f32[8,512], index: 4, kind: output, shape index: {}]  }
   0x1   :  { %11 = vsyncpa [#allocation4 + $0x1], 0  ;;  %s734_s15 = smov 0   ;;  %s736_s16 = smov 0  }
   0x2   :  { %s738_s17 = smov 0   ;;  %s740_s18 = smov 0  }
   0x3 LB: > { %s542_s19 = sadd.s32 4294967295, %s705_s18   ;;  %s543_s20 = sadd.s32 4294967294, %s705_s18   ;;  %s705_s18 = sphi %s740_s18, %s899_s18   ;;  %s701_s17 = sphi %s738_s17, %s898_s17   ;;  %s697_s16 = sphi %s736_s16, %s897_s16   ;;  %s693_s15 = sphi %s734_s15, %s896_s15  }
   0x4   : > { %s757_s21 = sadd.s32 1, %s705_s18   ;;  %s87_s22 = sadd.s32 1, %s701_s17 }
   0x5   : > { %s84_s23 = ssub.s32 %s705_s18, %s757_s21  ;;  %p94_p0 = scmp.ne.s32.totalorder %s701_s17, %s697_s16 }
   0x6   : > { %p85_p1 = scmp.eq.s32.totalorder %s84_s23, 0  ;;  %p95_p2 = scmp.eq.s32.totalorder %s705_s18, 0 }
   0x7   : > { %p124_p3 = scmp.eq.s32.totalorder %s542_s19, 1  ;;  %p129_p4 = scmp.ne.s32.totalorder %s697_s16, %s693_s15 }
   0x8   : > { %s770_s24 = scalar_select %p85_p1, %s701_s17, %s87_s22  }
   0x9   : > { %p96_p5 = por %p95_p2, %p94_p0  ;;  %p772_p6 = por %p124_p3, %p94_p0 }
   0xa   : > { %p130_p7 = scmp.eq.s32.totalorder %s543_s20, 1  ;;  %p545_p9 = scmp.ge.s32.totalorder %s705_s18, 2 }
   0xc   : > { %p776_p8 = por %p130_p7, %p129_p4  ;;  %155 = sbr.rel (%p545_p9) target bundleno = 31 (0x1f), region = 28 }
  0x13   : > { %158 = sbr.rel (!%p96_p5) target bundleno = 31 (0x1f), region = 32  ;;  %s160_s27 = sand.u32 (%p96_p5), 1, %s701_s17  }
  0x14   : > { %s575_s28 = sshll.u32 (%p96_p5), %s705_s18, 3  ;;  %s546_s29 = sshll.u32 (%p96_p5), %s160_s27, 7 }
  0x15   : > { %s788_s6 = scalar_lea.vmem (%p96_p5), %s892_s3, %s575_s28  ;;  %s162_s7 = scalar_lea.vmem (%p96_p5), [#allocation2], %s546_s29 }
  0x16   : > { %v223_v0 = vld [vmem:[%s788_s6] sm:$0xff] (%p96_p5)  ;;  %v225_v1 = vld [vmem:[%s788_s6 + $0x10] sm:$0xff] (%p96_p5) }
  0x17   : > { %v227_v2 = vld [vmem:[%s788_s6 + $0x20] sm:$0xff] (%p96_p5)  ;;  %224 = vst [vmem:[%s162_s7] sm:$0xff] (%p96_p5), %v223_v0  ;;  %226 = vst [vmem:[%s162_s7 + $0x8] sm:$0xff] (%p96_p5), %v225_v1  ;;  %v229_v3 = vld [vmem:[%s788_s6 + $0x30] sm:$0xff] (%p96_p5) }
  0x18   : > { %228 = vst [vmem:[%s162_s7 + $0x10] sm:$0xff] (%p96_p5), %v227_v2  ;;  %v231_v4 = vld [vmem:[%s788_s6 + $0x40] sm:$0xff] (%p96_p5)  ;;  %v233_v5 = vld [vmem:[%s788_s6 + $0x50] sm:$0xff] (%p96_p5)  ;;  %230 = vst [vmem:[%s162_s7 + $0x18] sm:$0xff] (%p96_p5), %v229_v3 }
  0x19   : > { %232 = vst [vmem:[%s162_s7 + $0x20] sm:$0xff] (%p96_p5), %v231_v4  ;;  %234 = vst [vmem:[%s162_s7 + $0x28] sm:$0xff] (%p96_p5), %v233_v5  ;;  %v235_v6 = vld [vmem:[%s788_s6 + $0x60] sm:$0xff] (%p96_p5)  ;;  %v237_v7 = vld [vmem:[%s788_s6 + $0x70] sm:$0xff] (%p96_p5) }
  0x1a   : > { %v239_v8 = vld [vmem:[%s788_s6 + $0x80] sm:$0xff]  ;;  %236 = vst [vmem:[%s162_s7 + $0x30] sm:$0xff] %v235_v6  ;;  %238 = vst [vmem:[%s162_s7 + $0x38] sm:$0xff] %v237_v7  ;;  %v241_v9 = vld [vmem:[%s788_s6 + $0x90] sm:$0xff] }
  0x1b   : > { %240 = vst [vmem:[%s162_s7 + $0x40] sm:$0xff] %v239_v8  ;;  %v243_v10 = vld [vmem:[%s788_s6 + $0xa0] sm:$0xff]  ;;  %v245_v11 = vld [vmem:[%s788_s6 + $0xb0] sm:$0xff]  ;;  %242 = vst [vmem:[%s162_s7 + $0x48] sm:$0xff] %v241_v9 }
  0x1c   : > { %244 = vst [vmem:[%s162_s7 + $0x50] sm:$0xff] %v243_v10  ;;  %246 = vst [vmem:[%s162_s7 + $0x58] sm:$0xff] %v245_v11  ;;  %v247_v12 = vld [vmem:[%s788_s6 + $0xc0] sm:$0xff]  ;;  %v249_v13 = vld [vmem:[%s788_s6 + $0xd0] sm:$0xff] }
  0x1d   : > { %v251_v14 = vld [vmem:[%s788_s6 + $0xe0] sm:$0xff]  ;;  %248 = vst [vmem:[%s162_s7 + $0x60] sm:$0xff] %v247_v12  ;;  %250 = vst [vmem:[%s162_s7 + $0x68] sm:$0xff] %v249_v13  ;;  %v253_v15 = vld [vmem:[%s788_s6 + $0xf0] sm:$0xff] }
  0x1e   : > { %252 = vst [vmem:[%s162_s7 + $0x70] sm:$0xff] %v251_v14  ;;  %254 = vst [vmem:[%s162_s7 + $0x78] sm:$0xff] %v253_v15 }
  0x1f PF: > { %p549_p10 = scmp.ge.s32.totalorder %s705_s18, 1  ;;  %p259_p11 = scmp.lt.s32.totalorder %s705_s18, 3 }
  0x21   : > { %p260_p12 = pnand %p549_p10, %p259_p11 }
  0x22   : > { %v294_v16 = vld [vmem:[%s889_s0] sm:$0xff] (!%p260_p12)  ;;  %s812_s10 = sand.u32 (!%p260_p12), 1, %s697_s16   ;;  %v707_v32 = vmov (!%p260_p12), 0   ;;  %s576_s29 = sshll.u32 (!%p260_p12), %s542_s19, 8 }
  0x23   : > { %263 = sbr.rel (%p260_p12) target bundleno = 576 (0x240), region = 70  ;;  %297 = vadd.xlane.f32.xlu0 (!%p260_p12), %v294_v16  ;;  %s550_s11 = sshll.u32 (!%p260_p12), %s812_s10, 7  ;;  %452 = vmatprep.mubr.bf16.mxu0 (!%p260_p12), %v707_v32  ;;  %v552_v42 = vld [vmem:[%s890_s1] ss:$0 sm:$0xff] (!%p260_p12) }
  0x24   : > { %s815_s12 = scalar_lea.vmem (!%p260_p12), [#allocation2], %s550_s11  ;;  %v553_v44 = vld [vmem:[%s891_s2] ss:$0 sm:$0xff] (!%p260_p12)  ;;  %s551_s23 = sshll.u32 (!%p260_p12), %s812_s10, 4 }
  0x25   : > { %v617_v17 = vld [vmem:[%s815_s12 + $0x4] ss:$8 sps:$4 sm:$0xff] (!%p260_p12)   ;;  %v619_v18 = vld [vmem:[%s815_s12] ss:$8 sps:$4 sm:$0xff] (!%p260_p12)   ;;  %v620_v19 = vld [vmem:[%s815_s12 + $0x14] ss:$8 sps:$4 sm:$0xff] (!%p260_p12)   ;;  %s847_s6 = scalar_lea.hbm (!%p260_p12), %s893_s4, %s576_s29 }
  0x26   : > { %420 = vmatprep.subr.bf16.mxu0 (!%p260_p12), %v617_v17  ;;  %v622_v20 = vld [vmem:[%s815_s12 + $0x10] ss:$8 sps:$4 sm:$0xff] (!%p260_p12)   ;;  %v623_v25 = vld [vmem:[%s815_s12 + $0x24] ss:$8 sps:$4 sm:$0xff] (!%p260_p12)   ;;  %v625_v26 = vld [vmem:[%s815_s12 + $0x20] ss:$8 sps:$4 sm:$0xff] (!%p260_p12)  }
  0x27   : > { %421 = vmatpush1.bf16.msra.mxu0 (!%p260_p12), %v619_v18  ;;  %v626_v27 = vld [vmem:[%s815_s12 + $0x34] ss:$8 sps:$4 sm:$0xff] (!%p260_p12)   ;;  %v628_v28 = vld [vmem:[%s815_s12 + $0x30] ss:$8 sps:$4 sm:$0xff] (!%p260_p12)   ;;  %v629_v29 = vld [vmem:[%s815_s12 + $0x44] ss:$8 sps:$4 sm:$0xff] (!%p260_p12)  }
  0x28   : > { %422 = vmatprep.subr.bf16.mxu0 (!%p260_p12), %v620_v19  ;;  %v631_v30 = vld [vmem:[%s815_s12 + $0x40] ss:$8 sps:$4 sm:$0xff] (!%p260_p12)   ;;  %v632_v31 = vld [vmem:[%s815_s12 + $0x54] ss:$8 sps:$4 sm:$0xff] (!%p260_p12)   ;;  %v634_v33 = vld [vmem:[%s815_s12 + $0x50] ss:$8 sps:$4 sm:$0xff] (!%p260_p12)  }
  0x29   : > { %v635_v34 = vld [vmem:[%s815_s12 + $0x64] ss:$8 sps:$4 sm:$0xff] (!%p260_p12)   ;;  %v637_v35 = vld [vmem:[%s815_s12 + $0x60] ss:$8 sps:$4 sm:$0xff] (!%p260_p12)   ;;  %v638_v36 = vld [vmem:[%s815_s12 + $0x74] ss:$8 sps:$4 sm:$0xff] (!%p260_p12)  }
  0x2a   : > { %v640_v37 = vld [vmem:[%s815_s12 + $0x70] ss:$8 sps:$4 sm:$0xff]   ;;  %s290_s27 = scalar_lea.vmem [#allocation3], %s551_s23  ;;  %s464_s7 = scalar_lea.sflag [#allocation4], %s812_s10 }
  0x2b   : > { %423 = vmatpush1.bf16.msra.mxu0 %v622_v20  ;;  %s478_s28 = sshll.u32 %s290_s27, 4  ;;  %s708_s19 = smov [#allocation3]   ;;  %s842_s28 = int_to_ptr.vmem [resolvable:$true] %s478_s28 }
  0x2c   : > { %424 = vmatprep.subr.bf16.mxu0 %v623_v25  ;;  %s643_s8 = scalar_lea.vmem %s842_s28, 256  ;;  %s647_s9 = sshll.u32 %s708_s19, 4  ;;  %s648_s9 = int_to_ptr.vmem [resolvable:$false] %s647_s9 }
  0x2d   : > { %p644_p13 = scmp.ne.s32.totalorder %s842_s28, %s643_s8  ;;  %s649_s11 = scalar_lea.vmem %s648_s9, 512 }
  0x2e   : > { %p650_p2 = scmp.lt.s32.totalorder %s842_s28, %s648_s9  ;;  %p651_p3 = scmp.lt.s32.totalorder %s649_s11, %s643_s8 }
  0x2f   : > { %425 = vmatpush1.bf16.msra.mxu0 %v625_v26  ;;  %p645_p0 = pnand %p644_p13, %p772_p6 }
  0x30   : > { %426 = vmatprep.subr.bf16.mxu0 %v626_v27  ;;  %p652_p4 = por %p651_p3, %p650_p2 }
  0x31   : > { %p646_p1 = pneg %p645_p0 }
  0x33   : > { %427 = vmatpush1.bf16.msra.mxu0 %v628_v28  ;;  %p653_p5 = pnand %p652_p4, %p646_p1 }
  0x34   : > { %428 = vmatprep.subr.bf16.mxu0 %v629_v29 }
  0x37   : > { %429 = vmatpush1.bf16.msra.mxu0 %v631_v30 }
  0x38   : > { %430 = vmatprep.subr.bf16.mxu0 %v632_v31 }
  0x3b   : > { %431 = vmatpush1.bf16.msra.mxu0 %v634_v33 }
  0x3c   : > { %432 = vmatprep.subr.bf16.mxu0 %v635_v34 }
  0x3f   : > { %433 = vmatpush1.bf16.msra.mxu0 %v637_v35 }
  0x40   : > { %434 = vmatprep.subr.bf16.mxu0 %v638_v36 }
  0x43   : > { %435 = vmatpush1.bf16.msra.mxu0 %v640_v37 }
  0xb0   : > { %v298_v21 = vpop.xlane.xlu0 %297 }
  0xb1   : > { %v300_v22 = vmul.f32 0.0078125, %v298_v21 }
  0xb3   : > { %v301_v23 = vsub.f32 %v294_v16, %v300_v22 }
  0xb5   : > { %v302_v24 = vmul.f32 %v301_v23, %v301_v23 }
  0xb7   : > { %303 = vadd.xlane.f32.xlu0 %v302_v24 }
 0x144   : > { %v304_v38 = vpop.xlane.xlu0 %303 }
 0x145   : > { %v305_v39 = vmul.f32 0.0078125, %v304_v38 }
 0x147   : > { %v306_v40 = vadd.f32 1e-05, %v305_v39 }
 0x149   : > { %641 = vrsqrt.f32 %v306_v40 }
 0x153   : > { %v642_v41 = vpop.eup %641 }
 0x154   : > { %v308_v43 = vmul.f32 %v642_v41, %v301_v23 }
 0x156   : > { %v315_v45 = vmul.f32 %v552_v42, %v308_v43 }
 0x158   : > { %v322_v46 = vadd.f32 %v553_v44, %v315_v45 }
 0x15a   : > { %v339_v47 = vpack.c.bf16 %v322_v46, %v322_v46 }
 0x15c   : > { %453 = vmatmul.mubr.bf16.vlgmr.msra.gmra.mrb[0].mxu0 %v339_v47 }
 0x22f   : > { %v454_v48 = vpop.f32.mrb[0].mxu0 }
 0x230   : > { %461 = vst [vmem:[%s290_s27] sm:$0xff] %v454_v48  ;;  %v456_v49 = vpop.f32.mrb[1].mxu0 }
 0x231   : > { %462 = vst [vmem:[%s290_s27 + $0x8] sm:$0xff] %v456_v49  ;;  %v458_v50 = vpop.f32.mrb[2].mxu0 }
 0x232   : > { %v459_v51 = vpop.f32.mrb[3].mxu0 }
 0x233   : > { %656 = shalt.err (!%p653_p5)
}
 0x234   : > { %s657_s10 = scalar_lea.hbm %s847_s6, 256  ;;  %s661_s14 = scalar_lea.hbm %s893_s4, 512 }
 0x235   : > { %p658_p7 = scmp.ne.s32.totalorder %s847_s6, %s657_s10  ;;  %p662_p12 = scmp.lt.u32.totalorder %s847_s6, %s893_s4 }
 0x236   : > { %p663_p13 = scmp.lt.u32.totalorder %s661_s14, %s657_s10  ;;  %p665_p1 = scmp.lt.u32.totalorder %s657_s10, %s847_s6 }
 0x237   : > { %p659_p10 = pnand %p658_p7, %p772_p6 }
 0x238   : > { %p664_p0 = por %p663_p13, %p662_p12 }
 0x239   : > { %p660_p11 = pneg %p659_p10 }
 0x23a   : > { %p666_p2 = por %p665_p1, %p664_p0 }
 0x23c   : > { %p667_p3 = pnand %p666_p2, %p660_p11 }
 0x23e   : > { %670 = shalt.err (!%p667_p3)
}
 0x23f   : > { %577 = dma.vmem_to_hbm [thread:$0]  (%p772_p6), %s842_s28, 256, %s847_s6, %s464_s7  }
 0x240 PF: > { %s490_s23 = sand.u32 1, %s693_s15   ;;  %p580_p4 = pnand %p545_p9, %p776_p8 }
 0x241   : > { %s491_s27 = scalar_lea.sflag [#allocation4], %s490_s23 }
 0x242   : > { %688 = dma.done.wait (!%p580_p4), %s491_s27, 256  }
 0x243   : > { %690 = vsyncadd (!%p580_p4), %s491_s27, 4294967040  ;;  %p14_p5 = scmp.ge.s32.totalorder %s757_s21, 4   ;;  %s896_s15 = smov %s697_s16 }
 0x244   : > { %s897_s16 = smov %s701_s17  ;;  %s898_s17 = smov %s770_s24 }
 0x245   : > { %s899_s18 = smov %s757_s21  ;;  %16 = sbr.rel (!%p14_p5) target bundleno = 3 (0x3), region = 114 }
 0x24c   :  { %496 = vsyncpa [#allocation4], 1 }
 0x24d   :  { %498 = vsyncpa [#allocation4 + $0x1], 1 }

// kernel: rwkv_v4_forward.2
= control target key start
LH: loop header
LB: loop body
LE: loop exit
PB: predicated region body
PF: predicated region fallthrough
CT: control target
= control target key end

     0   :  { %s3457_s0 = inlined_call_operand.vmem [shape: f32[8,128], index: 0, kind: input, shape index: {}]   ;;  %s3458_s1 = inlined_call_operand.hbm [shape: f32[5,4,8,128], index: 1, kind: input, shape index: {}]   ;;  %s3459_s2 = inlined_call_operand.vmem [shape: f32[4,18,128], index: 2, kind: input, shape index: {}]   ;;  %s3460_s3 = inlined_call_operand.vmem [shape: bf16[4,128,128], index: 3, kind: input, shape index: {}]   ;;  %s3461_s4 = inlined_call_operand.hbm [shape: bf16[4,128,128], index: 4, kind: input, shape index: {}]   ;;  %s3462_s5 = inlined_call_operand.hbm [shape: bf16[4,128,128], index: 5, kind: input, shape index: {}]   ;;  %s3463_s6 = inlined_call_operand.hbm [shape: bf16[4,128,128], index: 6, kind: input, shape index: {}]   ;;  %s3464_s7 = inlined_call_operand.hbm [shape: bf16[4,128,256], index: 7, kind: input, shape index: {}]   ;;  %s3465_s8 = inlined_call_operand.hbm [shape: bf16[4,128,128], index: 8, kind: input, shape index: {}]   ;;  %s3466_s9 = inlined_call_operand.hbm [shape: bf16[4,256,128], index: 9, kind: input, shape index: {}]   ;;  %s3467_s10 = inlined_call_operand.vmem [shape: f32[8,128], index: 10, kind: output, shape index: {0}]   ;;  %s3468_s11 = inlined_call_operand.hbm [shape: f32[5,4,8,128], index: 11, kind: output, shape index: {1}]  }
   0x1   :  { %3486 = sst [smem:[#allocation26_spill]] %s3457_s0 }
   0x2   :  { %3487 = sst [smem:[#allocation27_spill]] %s3458_s1 }
   0x3   :  { %3488 = sst [smem:[#allocation28_spill]] %s3461_s4 }
   0x4   :  { %3489 = sst [smem:[#allocation29_spill]] %s3463_s6 }
   0x5   :  { %3490 = sst [smem:[#allocation30_spill]] %s3465_s8 }
   0x6   :  { %3491 = sst [smem:[#allocation31_spill]] %s3467_s10 }
   0x7   :  { %3492 = sst [smem:[#allocation32_spill]] %s3468_s11 }
   0x8   :  { %17 = vsyncpa [#allocation3], 0 }
   0x9   :  { %19 = vsyncpa [#allocation3 + $0x1], 0 }
   0xa   :  { %20 = vsyncpa [#allocation6], 0 }
   0xb   :  { %22 = vsyncpa [#allocation6 + $0x1], 0 }
   0xc   :  { %23 = vsyncpa [#allocation9], 0 }
   0xd   :  { %25 = vsyncpa [#allocation9 + $0x1], 0 }
   0xe   :  { %26 = vsyncpa [#allocation12], 0 }
   0xf   :  { %28 = vsyncpa [#allocation12 + $0x1], 0 }
  0x10   :  { %29 = vsyncpa [#allocation4], 0 }
  0x11   :  { %31 = vsyncpa [#allocation4 + $0x1], 0  ;;  %s2799_s17 = smov 0   ;;  %s2801_s18 = smov 0  }
  0x12   :  { %s2803_s19 = smov 0   ;;  %s2805_s20 = smov 0  }
  0x13 LB: > { %3493 = sst [smem:[#allocation20_spill]] %s2706_s17  ;;  %s2820_s21 = sadd.s32 4294967295, %s2718_s20   ;;  %s2718_s20 = sphi %s2805_s20, %s3527_s20   ;;  %s2714_s19 = sphi %s2803_s19, %s3529_s19   ;;  %s2710_s18 = sphi %s2801_s18, %s3531_s18   ;;  %s2706_s17 = sphi %s2799_s17, %s3530_s17  }
  0x14   : > { %3494 = sst [smem:[#allocation21_spill]] %s2714_s19  ;;  %s1954_s22 = sadd.s32 4294967294, %s2718_s20  }
  0x15   : > { %s2824_s23 = sadd.s32 1, %s2718_s20   ;;  %s65_s24 = sadd.s32 1, %s2714_s19 }
  0x16   : > { %3495 = sst [smem:[#allocation22_spill]] %s2824_s23  ;;  %s62_s25 = ssub.s32 %s2718_s20, %s2824_s23 }
  0x17   : > { %p72_p0 = scmp.ne.s32.totalorder %s2714_s19, %s2710_s18  ;;  %p63_p1 = scmp.eq.s32.totalorder %s62_s25, 0 }
  0x18   : > { %p73_p2 = scmp.eq.s32.totalorder %s2718_s20, 0  ;;  %p78_p3 = scmp.ne.s32.totalorder %s2710_s18, %s2706_s17 }
  0x19   : > { %p79_p4 = scmp.eq.s32.totalorder %s2820_s21, 0  ;;  %p331_p7 = scmp.eq.s32.totalorder %s2820_s21, 3 }
  0x1a   : > { %s2836_s26 = scalar_select %p63_p1, %s2714_s19, %s65_s24  }
  0x1b   : > { %p74_p5 = por %p73_p2, %p72_p0  ;;  %p2838_p6 = por %p79_p4, %p78_p3 }
  0x1c   : > { %3496 = sst [smem:[#allocation23_spill]] %s2836_s26  ;;  %p337_p8 = scmp.eq.s32.totalorder %s1954_s22, 3 }
  0x1d   : > { %s3497_s27 = scalar_select %p2838_p6, 1, 0 }
  0x1e   : > { %p2289_p9 = scmp.lt.s32.totalorder %s2718_s20, 4  ;;  %p2844_p10 = por %p331_p7, %p72_p0 }
  0x1f   : > { %p2848_p11 = por %p337_p8, %p78_p3  ;;  %s2853_s30 = sand.u32 1, %s2714_s19  }
  0x20   : > { %s3498_s28 = scalar_select %p2844_p10, 1, 0 }
  0x21   : > { %s3500_s29 = scalar_select %p2848_p11, 1, 0 }
  0x22   : > { %3499 = sst [smem:[#allocation24_spill]] %s3498_s28  ;;  %p2855_p12 = pnand %p2289_p9, %p74_p5 }
  0x23   : > { %3501 = sst [smem:[#allocation25_spill]] %s3500_s29  ;;  %s2860_s13 = sand.u32 1, %s2718_s20  }
  0x24   : > { %s2863_s14 = sshll.u32 %s2853_s30, 6  ;;  %s2866_s15 = sshll.u32 %s2718_s20, 10 }
  0x25   : > { %s3503_s4 = sld [smem:[#allocation28_spill]]  ;;  %s400_s25 = scalar_lea.vmem [#allocation5], %s2863_s14 }
  0x26   : > { %s407_s26 = sshll.u32 %s400_s25, 4  ;;  %p2883_p1 = pneg %p2855_p12  ;;  %s2875_s26 = int_to_ptr.vmem [resolvable:$true] %s407_s26 }
  0x2b   : > { %s2872_s24 = scalar_lea.hbm %s3503_s4, %s2866_s15  ;;  %s2435_s17 = scalar_lea.hbm %s3503_s4, 4096 }
  0x2c   : > { %s2430_s23 = scalar_lea.hbm %s2872_s24, 1024  ;;  %p2436_p4 = scmp.lt.u32.totalorder %s2872_s24, %s3503_s4 }
  0x2d   : > { %p2431_p0 = scmp.ne.s32.totalorder %s2872_s24, %s2430_s23  ;;  %p2437_p5 = scmp.lt.u32.totalorder %s2435_s17, %s2430_s23 }
  0x2e   : > { %p2439_p8 = scmp.lt.u32.totalorder %s2430_s23, %s2872_s24 }
  0x2f   : > { %p2433_p2 = pnand %p2883_p1, %p2431_p0  ;;  %p2438_p7 = por %p2437_p5, %p2436_p4 }
  0x31   : > { %p2434_p3 = pneg %p2433_p2  ;;  %p2440_p9 = por %p2439_p8, %p2438_p7 }
  0x33   : > { %p2441_p13 = pnand %p2440_p9, %p2434_p3 }
  0x35   : > { %2444 = shalt.err (!%p2441_p13)
}
  0x36   : > { %s2445_s19 = scalar_lea.vmem %s2875_s26, 1024  ;;  %s2720_s16 = smov [#allocation5]  }
  0x37   : > { %p2446_p0 = scmp.ne.s32.totalorder %s2875_s26, %s2445_s19  ;;  %s2450_s22 = sshll.u32 %s2720_s16, 4  ;;  %s2451_s22 = int_to_ptr.vmem [resolvable:$false] %s2450_s22 }
  0x38   : > { %s2452_s11 = scalar_lea.vmem %s2451_s22, 2048  ;;  %p2453_p10 = scmp.lt.s32.totalorder %s2875_s26, %s2451_s22 }
  0x39   : > { %p2448_p2 = pnand %p2446_p0, %p2883_p1  ;;  %p2454_p6 = scmp.lt.s32.totalorder %s2452_s11, %s2445_s19 }
  0x3b   : > { %p2449_p11 = pneg %p2448_p2  ;;  %p2455_p4 = por %p2454_p6, %p2453_p10 }
  0x3d   : > { %p2456_p5 = pnand %p2455_p4, %p2449_p11 }
  0x3f   : > { %2459 = shalt.err (!%p2456_p5)
}
  0x40   : > { %s3479_s17 = smov 64   ;;  %s3481_s23 = smov 4  }
  0x41   : > { %s3505_s19 = scalar_lea.sflag [#allocation6], %s2860_s13  ;;  %p520_p6 = scmp.lt.s32.totalorder %s2718_s20, 5 }
  0x42   : > { %2269 = dma.hbm_to_vmem [thread:$0]  (!%p2855_p12), %s2872_s24, 1024, %s2875_s26, %s3505_s19, %s3479_s17, %s3479_s17, %s3481_s23  }
  0x43   : > { %s3506_s6 = sld [smem:[#allocation29_spill]]  ;;  %p3507_p10 = scmp.ge.s32.totalorder %s2718_s20, 1 }
  0x44   : > { %s442_s4 = scalar_lea.vmem [#allocation8], %s2863_s14  ;;  %s3484_s26 = scalar_lea.sflag [#allocation9], %s2860_s13 }
  0x45   : > { %p2920_p11 = pnand %p3507_p10, %p520_p6  ;;  %s449_s28 = sshll.u32 %s442_s4, 4  ;;  %s2925_s28 = int_to_ptr.vmem [resolvable:$true] %s449_s28 }
  0x47   : > { %s3508_s11 = scalar_select %p2920_p11, 1, 0 }
  0x49   : > { %s2916_s22 = scalar_lea.hbm %s3506_s6, %s2866_s15  ;;  %s2465_s16 = scalar_lea.hbm %s3506_s6, 4096 }
  0x4a   : > { %s2460_s24 = scalar_lea.hbm %s2916_s22, 1024  ;;  %p2466_p8 = scmp.lt.u32.totalorder %s2916_s22, %s3506_s6 }
  0x4b   : > { %p2461_p13 = scmp.ne.s32.totalorder %s2916_s22, %s2460_s24  ;;  %p2467_p9 = scmp.lt.u32.totalorder %s2465_s16, %s2460_s24 }
  0x4c   : > { %p2469_p2 = scmp.lt.u32.totalorder %s2460_s24, %s2916_s22 }
  0x4d   : > { %p2463_p3 = pnand %p2461_p13, %p2883_p1  ;;  %p2468_p0 = por %p2467_p9, %p2466_p8 }
  0x4f   : > { %p2464_p7 = pneg %p2463_p3  ;;  %p2470_p4 = por %p2469_p2, %p2468_p0 }
  0x51   : > { %p2471_p5 = pnand %p2470_p4, %p2464_p7 }
  0x53   : > { %2474 = shalt.err (!%p2471_p5)
}
  0x54   : > { %s2475_s4 = scalar_lea.vmem %s2925_s28, 1024  ;;  %s2723_s19 = smov [#allocation8]  }
  0x55   : > { %p2476_p6 = scmp.ne.s32.totalorder %s2925_s28, %s2475_s4  ;;  %s2480_s25 = sshll.u32 %s2723_s19, 4  ;;  %s2481_s25 = int_to_ptr.vmem [resolvable:$false] %s2480_s25 }
  0x56   : > { %s2482_s17 = scalar_lea.vmem %s2481_s25, 2048  ;;  %p2483_p3 = scmp.lt.s32.totalorder %s2925_s28, %s2481_s25 }
  0x57   : > { %p2478_p10 = pnand %p2476_p6, %p2883_p1  ;;  %p2484_p11 = scmp.lt.s32.totalorder %s2482_s17, %s2475_s4 }
  0x59   : > { %p2479_p13 = pneg %p2478_p10  ;;  %p2485_p8 = por %p2484_p11, %p2483_p3 }
  0x5b   : > { %p2486_p9 = pnand %p2485_p8, %p2479_p13 }
  0x5d   : > { %2489 = shalt.err (!%p2486_p9)
}
  0x5e   : > { %s3509_s23 = smov 4   ;;  %s3510_s24 = smov 64  }
  0x5f   : > { %2275 = dma.hbm_to_vmem [thread:$0]  (!%p2855_p12), %s2916_s22, 1024, %s2925_s28, %s3484_s26, %s3510_s24, %s3510_s24, %s3509_s23  }
  0x60   : > { %s3511_s8 = sld [smem:[#allocation30_spill]]  ;;  %s484_s25 = scalar_lea.vmem [#allocation11], %s2863_s14 }
  0x61   : > { %s491_s17 = sshll.u32 %s484_s25, 4  ;;  %s2244_s6 = smul.u32 40, %s2853_s30  ;;  %s2961_s17 = int_to_ptr.vmem [resolvable:$true] %s491_s17 }
  0x62   : > { %s3485_s10 = scalar_lea.sflag [#allocation12], %s2860_s13 }
  0x66   : > { %s2958_s19 = scalar_lea.hbm %s3511_s8, %s2866_s15  ;;  %s2495_s16 = scalar_lea.hbm %s3511_s8, 4096 }
  0x67   : > { %s2490_s0 = scalar_lea.hbm %s2958_s19, 1024  ;;  %p2496_p2 = scmp.lt.u32.totalorder %s2958_s19, %s3511_s8 }
  0x68   : > { %p2491_p11 = scmp.ne.s32.totalorder %s2958_s19, %s2490_s0  ;;  %p2497_p4 = scmp.lt.u32.totalorder %s2495_s16, %s2490_s0 }
  0x69   : > { %p2499_p6 = scmp.lt.u32.totalorder %s2490_s0, %s2958_s19 }
  0x6a   : > { %p2493_p7 = pnand %p2491_p11, %p2883_p1  ;;  %p2498_p5 = por %p2497_p4, %p2496_p2 }
  0x6c   : > { %p2494_p0 = pneg %p2493_p7  ;;  %p2500_p10 = por %p2499_p6, %p2498_p5 }
  0x6e   : > { %p2501_p13 = pnand %p2500_p10, %p2494_p0 }
  0x70   : > { %2504 = shalt.err (!%p2501_p13)
}
  0x71   : > { %s2505_s25 = scalar_lea.vmem %s2961_s17, 1024  ;;  %s2724_s28 = smov [#allocation11]  }
  0x72   : > { %p2506_p3 = scmp.ne.s32.totalorder %s2961_s17, %s2505_s25  ;;  %s2510_s22 = sshll.u32 %s2724_s28, 4  ;;  %s2511_s22 = int_to_ptr.vmem [resolvable:$false] %s2510_s22 }
  0x73   : > { %s2512_s26 = scalar_lea.vmem %s2511_s22, 2048  ;;  %p2513_p11 = scmp.lt.s32.totalorder %s2961_s17, %s2511_s22 }
  0x74   : > { %p2508_p8 = pnand %p2506_p3, %p2883_p1  ;;  %p2514_p7 = scmp.lt.s32.totalorder %s2512_s26, %s2505_s25 }
  0x76   : > { %p2509_p9 = pneg %p2508_p8  ;;  %p2515_p2 = por %p2514_p7, %p2513_p11 }
  0x78   : > { %p2516_p4 = pnand %p2515_p2, %p2509_p9 }
  0x7a   : > { %2519 = shalt.err (!%p2516_p4)
}
  0x7b   : > { %2281 = dma.hbm_to_vmem [thread:$0]  (!%p2855_p12), %s2958_s19, 1024, %s2961_s17, %s3485_s10, %s3510_s24, %s3510_s24, %s3509_s23  }
  0x7c   : > { %s1957_s0 = sshll.u32 %s2718_s20, 7  ;;  %s3512_s1 = sld [smem:[#allocation27_spill]] }
  0x7d   : > { %s364_s28 = scalar_lea.vmem [#allocation2], %s2244_s6  ;;  %s361_s26 = scalar_lea.sflag [#allocation3], %s2853_s30 }
  0x7e   : > { %s370_s22 = sshll.u32 %s364_s28, 4  ;;  %s2999_s22 = int_to_ptr.vmem [resolvable:$true] %s370_s22 }
  0x82   : > { %s2995_s25 = scalar_lea.hbm %s3512_s1, %s1957_s0  ;;  %s2525_s0 = scalar_lea.hbm %s3512_s1, 2560 }
  0x83   : > { %s2520_s8 = scalar_lea.hbm %s2995_s25, 640  ;;  %p2526_p10 = scmp.lt.u32.totalorder %s2995_s25, %s3512_s1 }
  0x84   : > { %p2521_p0 = scmp.ne.s32.totalorder %s2995_s25, %s2520_s8  ;;  %p2527_p13 = scmp.lt.u32.totalorder %s2525_s0, %s2520_s8 }
  0x85   : > { %p2529_p8 = scmp.lt.u32.totalorder %s2520_s8, %s2995_s25 }
  0x86   : > { %p2523_p5 = pnand %p2521_p0, %p2883_p1  ;;  %p2528_p3 = por %p2527_p13, %p2526_p10 }
  0x88   : > { %p2524_p6 = pneg %p2523_p5  ;;  %p2530_p9 = por %p2529_p8, %p2528_p3 }
  0x8a   : > { %p2531_p11 = pnand %p2530_p9, %p2524_p6 }
  0x8c   : > { %2534 = shalt.err (!%p2531_p11)
}
  0x8d   : > { %s2535_s6 = scalar_lea.vmem %s2999_s22, 640  ;;  %s2725_s28 = smov [#allocation2]  }
  0x8e   : > { %p2536_p7 = scmp.ne.s32.totalorder %s2999_s22, %s2535_s6  ;;  %s2540_s19 = sshll.u32 %s2725_s28, 4  ;;  %s2541_s19 = int_to_ptr.vmem [resolvable:$false] %s2540_s19 }
  0x8f   : > { %s2542_s17 = scalar_lea.vmem %s2541_s19, 1280  ;;  %p2543_p0 = scmp.lt.s32.totalorder %s2999_s22, %s2541_s19 }
  0x90   : > { %p2538_p2 = pnand %p2536_p7, %p2883_p1  ;;  %p2544_p5 = scmp.lt.s32.totalorder %s2542_s17, %s2535_s6 }
  0x92   : > { %p2539_p4 = pneg %p2538_p2  ;;  %p2545_p10 = por %p2544_p5, %p2543_p0 }
  0x94   : > { %p2546_p13 = pnand %p2545_p10, %p2539_p4 }
  0x96   : > { %2549 = shalt.err (!%p2546_p13)
}
  0x97   : > { %s2726_s8 = smov 512   ;;  %s2727_s0 = smov 128  }
  0x98   : > { %s2728_s16 = smov 8   ;;  %s3031_s28 = scalar_lea.hbm %s3462_s5, %s2866_s15 }
  0x99   : > { %2266 = dma.hbm_to_vmem [thread:$0]  (!%p2855_p12), %s2995_s25, 640, %s2999_s22, %s361_s26, %s2726_s8, %s2727_s0, %s2728_s16  }
  0x9a   : > { %s421_s19 = scalar_lea.vmem [#allocation7], %s2863_s14  ;;  %s1967_s10 = sshll.u32 %s2853_s30, 7 }
  0x9b   : > { %s428_s17 = sshll.u32 %s421_s19, 4  ;;  %s2550_s1 = scalar_lea.hbm %s3031_s28, 1024  ;;  %s3035_s17 = int_to_ptr.vmem [resolvable:$true] %s428_s17 }
  0x9c   : > { %p2551_p6 = scmp.ne.s32.totalorder %s3031_s28, %s2550_s1  ;;  %s2555_s26 = scalar_lea.hbm %s3462_s5, 4096 }
  0x9d   : > { %p2556_p9 = scmp.lt.u32.totalorder %s3031_s28, %s3462_s5  ;;  %p2557_p11 = scmp.lt.u32.totalorder %s2555_s26, %s2550_s1 }
  0x9e   : > { %p2553_p3 = pnand %p2551_p6, %p2883_p1  ;;  %p2559_p2 = scmp.lt.u32.totalorder %s2550_s1, %s3031_s28 }
  0x9f   : > { %p2558_p7 = por %p2557_p11, %p2556_p9 }
  0xa0   : > { %p2554_p8 = pneg %p2553_p3 }
  0xa1   : > { %p2560_p4 = por %p2559_p2, %p2558_p7 }
  0xa3   : > { %p2561_p0 = pnand %p2560_p4, %p2554_p8 }
  0xa5   : > { %2564 = shalt.err (!%p2561_p0)
}
  0xa6   : > { %s2565_s14 = scalar_lea.vmem %s3035_s17, 1024  ;;  %s2729_s4 = smov [#allocation7]  }
  0xa7   : > { %p2566_p5 = scmp.ne.s32.totalorder %s3035_s17, %s2565_s14  ;;  %s2570_s6 = sshll.u32 %s2729_s4, 4  ;;  %s2571_s6 = int_to_ptr.vmem [resolvable:$false] %s2570_s6 }
  0xa8   : > { %s2572_s19 = scalar_lea.vmem %s2571_s6, 2048  ;;  %p2573_p6 = scmp.lt.s32.totalorder %s3035_s17, %s2571_s6 }
  0xa9   : > { %p2568_p10 = pnand %p2566_p5, %p2883_p1  ;;  %p2574_p3 = scmp.lt.s32.totalorder %s2572_s19, %s2565_s14 }
  0xab   : > { %p2569_p13 = pneg %p2568_p10  ;;  %p2575_p9 = por %p2574_p3, %p2573_p6 }
  0xad   : > { %p2576_p11 = pnand %p2575_p9, %p2569_p13 }
  0xaf   : > { %2579 = shalt.err (!%p2576_p11)
}
  0xb0   : > { %s3513_s1 = scalar_lea.sflag [#allocation6], %s2860_s13  ;;  %s2073_s25 = sshll.u32 %s2718_s20, 11 }
  0xb1   : > { %2272 = dma.hbm_to_vmem [thread:$0]  (!%p2855_p12), %s3031_s28, 1024, %s3035_s17, %s3513_s1, %s3510_s24, %s3510_s24, %s3509_s23  }
  0xb2   : > { %s463_s22 = scalar_lea.vmem [#allocation10], %s1967_s10  ;;  %s3071_s14 = scalar_lea.hbm %s3464_s7, %s2073_s25 }
  0xb3   : > { %s470_s26 = sshll.u32 %s463_s22, 4  ;;  %s2580_s4 = scalar_lea.hbm %s3071_s14, 2048  ;;  %s3073_s26 = int_to_ptr.vmem [resolvable:$true] %s470_s26 }
  0xb4   : > { %p2581_p8 = scmp.ne.s32.totalorder %s3071_s14, %s2580_s4  ;;  %s2585_s6 = scalar_lea.hbm %s3464_s7, 8192 }
  0xb5   : > { %p2586_p4 = scmp.lt.u32.totalorder %s3071_s14, %s3464_s7  ;;  %p2587_p0 = scmp.lt.u32.totalorder %s2585_s6, %s2580_s4 }
  0xb6   : > { %p2583_p7 = pnand %p2581_p8, %p2883_p1  ;;  %p2589_p10 = scmp.lt.u32.totalorder %s2580_s4, %s3071_s14 }
  0xb7   : > { %p2588_p5 = por %p2587_p0, %p2586_p4 }
  0xb8   : > { %p2584_p2 = pneg %p2583_p7 }
  0xb9   : > { %p2590_p13 = por %p2589_p10, %p2588_p5 }
  0xbb   : > { %p2591_p6 = pnand %p2590_p13, %p2584_p2 }
  0xbd   : > { %2594 = shalt.err (!%p2591_p6)
}
  0xbe   : > { %s2595_s22 = scalar_lea.vmem %s3073_s26, 2048  ;;  %s2730_s15 = smov [#allocation10]  }
  0xbf   : > { %p2596_p3 = scmp.ne.s32.totalorder %s3073_s26, %s2595_s22  ;;  %s2600_s8 = sshll.u32 %s2730_s15, 4  ;;  %s2601_s8 = int_to_ptr.vmem [resolvable:$false] %s2600_s8 }
  0xc0   : > { %s2602_s28 = scalar_lea.vmem %s2601_s8, 4096  ;;  %p2603_p8 = scmp.lt.s32.totalorder %s3073_s26, %s2601_s8 }
  0xc1   : > { %p2598_p9 = pnand %p2596_p3, %p2883_p1  ;;  %p2604_p7 = scmp.lt.s32.totalorder %s2602_s28, %s2595_s22 }
  0xc3   : > { %p2599_p11 = pneg %p2598_p9  ;;  %p2605_p4 = por %p2604_p7, %p2603_p8 }
  0xc5   : > { %p2606_p0 = pnand %p2605_p4, %p2599_p11 }
  0xc7   : > { %2609 = shalt.err (!%p2606_p0)
}
  0xc8   : > { %s3514_s4 = scalar_lea.sflag [#allocation9], %s2860_s13  ;;  %s3106_s19 = scalar_lea.hbm %s3466_s9, %s2073_s25 }
  0xc9   : > { %2278 = dma.hbm_to_vmem [thread:$0]  (!%p2855_p12), %s3071_s14, 2048, %s3073_s26, %s3514_s4, %s2727_s0, %s2727_s0, %s2728_s16  }
  0xca   : > { %s505_s1 = scalar_lea.vmem [#allocation13], %s1967_s10  ;;  %s2610_s15 = scalar_lea.hbm %s3106_s19, 2048 }
  0xcb   : > { %s512_s22 = sshll.u32 %s505_s1, 4  ;;  %p2611_p2 = scmp.ne.s32.totalorder %s3106_s19, %s2610_s15  ;;  %s3110_s22 = int_to_ptr.vmem [resolvable:$true] %s512_s22 }
  0xcc   : > { %s2615_s26 = scalar_lea.hbm %s3466_s9, 8192  ;;  %p2616_p13 = scmp.lt.u32.totalorder %s3106_s19, %s3466_s9 }
  0xcd   : > { %p2613_p5 = pnand %p2611_p2, %p2883_p1  ;;  %p2617_p6 = scmp.lt.u32.totalorder %s2615_s26, %s2610_s15 }
  0xce   : > { %p2619_p9 = scmp.lt.u32.totalorder %s2610_s15, %s3106_s19 }
  0xcf   : > { %p2614_p10 = pneg %p2613_p5  ;;  %p2618_p3 = por %p2617_p6, %p2616_p13 }
  0xd1   : > { %p2620_p11 = por %p2619_p9, %p2618_p3 }
  0xd3   : > { %p2621_p8 = pnand %p2620_p11, %p2614_p10 }
  0xd5   : > { %2624 = shalt.err (!%p2621_p8)
}
  0xd6   : > { %s2625_s10 = scalar_lea.vmem %s3110_s22, 2048  ;;  %s2731_s30 = smov [#allocation13]  }
  0xd7   : > { %p2626_p7 = scmp.ne.s32.totalorder %s3110_s22, %s2625_s10  ;;  %s2630_s8 = sshll.u32 %s2731_s30, 4  ;;  %s2631_s8 = int_to_ptr.vmem [resolvable:$false] %s2630_s8 }
  0xd8   : > { %s2632_s28 = scalar_lea.vmem %s2631_s8, 4096  ;;  %p2633_p2 = scmp.lt.s32.totalorder %s3110_s22, %s2631_s8 }
  0xd9   : > { %p2628_p4 = pnand %p2626_p7, %p2883_p1  ;;  %p2634_p5 = scmp.lt.s32.totalorder %s2632_s28, %s2625_s10 }
  0xdb   : > { %p2629_p0 = pneg %p2628_p4  ;;  %p2635_p13 = por %p2634_p5, %p2633_p2 }
  0xdd   : > { %p2636_p6 = pnand %p2635_p13, %p2629_p0 }
  0xdf   : > { %2639 = shalt.err (!%p2636_p6)
}
  0xe0   : > { %s3515_s4 = scalar_lea.sflag [#allocation12], %s2860_s13  ;;  %p3516_p1 = scmp.ne.s32.totalorder %s3508_s11, 0 }
  0xe1   : > { %2284 = dma.hbm_to_vmem [thread:$0]  (!%p2855_p12), %s3106_s19, 2048, %s3110_s22, %s3515_s4, %s3510_s24, %s3510_s24, %s3509_s23  }
  0xe2   : > { %524 = sbr.rel (%p3516_p1) target bundleno = 2118 (0x846), region = 60  ;;  %s3141_s29 = sand.u32 (!%p3516_p1), 1, %s2710_s18  }
  0xe3   : > { %s2245_s17 = smul.u32 (!%p3516_p1), 40, %s3141_s29  ;;  %s527_s12 = scalar_lea.sflag (!%p3516_p1), [#allocation3], %s3141_s29 }
  0xe4   : > { %p3517_p10 = scmp.ne.s32.totalorder (!%p3516_p1), %s3497_s27, 0 }
  0xe5   : > { %s3147_s6 = scalar_lea.vmem (!%p3516_p1), [#allocation2], %s2245_s17 }
  0xe9   : > { %2685 = dma.done.wait (%p3517_p10), %s527_s12, 640  }
  0xea   : > { %2687 = vsyncadd (%p3517_p10), %s527_s12, 4294966656  ;;  %s535_s13 = sand.u32 1, %s2820_s21   ;;  %s1977_s11 = sshll.u32 %s3141_s29, 6 }
  0xeb   : > { %s536_s23 = scalar_lea.sflag [#allocation6], %s535_s13  ;;  %s3155_s24 = scalar_lea.vmem [#allocation5], %s1977_s11 }
  0xec   : > { %2689 = dma.done.wait (%p3517_p10), %s536_s23, 2048  }
  0xed   : > { %2691 = vsyncadd (%p3517_p10), %s536_s23, 4294965248  ;;  %s3161_s19 = scalar_lea.vmem [#allocation7], %s1977_s11  ;;  %s554_s1 = scalar_lea.sflag [#allocation9], %s535_s13 }
  0xee   : > { %s3163_s22 = scalar_lea.vmem [#allocation8], %s1977_s11 }
  0xef   : > { %2693 = dma.done.wait (%p3517_p10), %s554_s1, 3072  }
  0xf0   : > { %2695 = vsyncadd (%p3517_p10), %s554_s1, 4294964224  ;;  %s1980_s15 = sshll.u32 %s3141_s29, 7  ;;  %s572_s16 = scalar_lea.sflag [#allocation12], %s535_s13 }
  0xf1   : > { %s3170_s0 = scalar_lea.vmem [#allocation10], %s1980_s15  ;;  %s3172_s26 = scalar_lea.vmem [#allocation11], %s1977_s11 }
  0xf2   : > { %2697 = dma.done.wait (%p3517_p10), %s572_s16, 3072  }
  0xf3   : > { %2699 = vsyncadd (%p3517_p10), %s572_s16, 4294964224  ;;  %p663_p12 = scmp.lt.s32.totalorder %s2820_s21, 3  ;;  %s3194_s27 = scalar_lea.vmem [#allocation13], %s1980_s15 }
  0xf4   : > { %s3198_s11 = scalar_lea.vmem [#allocation14], %s2245_s17  ;;  %p1986_p3 = scmp.ne.s32.totalorder %s2820_s21, 0 }
  0xf5   : > { %s664_s25 = scalar_select %p663_p12, %s2820_s21, 3 }
  0xf6   : > { %680 = sbr.rel (%p1986_p3) target bundleno = 565 (0x235), region = 92  ;;  %s3518_s16 = sld [smem:[#allocation26_spill]] (!%p1986_p3)  ;;  %v694_v10 = vlaneseq (!%p1986_p3) }
  0xf7   : > { %s2246_s14 = smul.u32 24, %s664_s25  ;;  %s2076_s10 = sshll.u32 %s664_s25, 6 }
  0xf8   : > { %s3183_s28 = scalar_lea.vmem %s3460_s3, %s2076_s10  ;;  %v695_v12 = vshrl.u32 (!%p1986_p3), %v694_v10, 7  ;;  %s3519_s25 = sld [smem:[#allocation31_spill]] (!%p1986_p3) }
  0xf9   : > { %s667_s13 = scalar_lea.vmem %s3459_s2, %s2246_s14 }
  0xfa   : > { %v3188_v0 = vld [vmem:[%s667_s13] sm:$0xff]  ;;  %v3190_v1 = vld [vmem:[%s667_s13 + $0x8] sm:$0xff]  ;;  %v3192_v2 = vld [vmem:[%s667_s13 + $0x10] sm:$0x3]  ;;  %v696_v13 = vsub.s32 (!%p1986_p3), 0, %v695_v12  ;;  %v701_v14 = vsub.s32 (!%p1986_p3), 1, %v695_v12 }
  0xfc   : > { %v681_v3 = vld [vmem:[%s3518_s16] sm:$0xff] (!%p1986_p3)  ;;  %v697_v15 = vrot.slane (!%p1986_p3), %v3188_v0, %v696_v13  ;;  %v702_v17 = vrot.slane (!%p1986_p3), %v3188_v0, %v701_v14 }
  0xfd   : > { %682 = vadd.xlane.f32.xlu0 %v681_v3 }
 0x18a   : > { %v683_v4 = vpop.xlane.xlu0 %682 }
 0x18b   : > { %v685_v5 = vmul.f32 0.0078125, %v683_v4 }
 0x18d   : > { %v686_v6 = vsub.f32 %v681_v3, %v685_v5 }
 0x18f   : > { %v687_v7 = vmul.f32 %v686_v6, %v686_v6 }
 0x191   : > { %688 = vadd.xlane.f32.xlu0 %v687_v7 }
 0x21e   : > { %v689_v8 = vpop.xlane.xlu0 %688 }
 0x21f   : > { %v690_v9 = vmul.f32 0.0078125, %v689_v8 }
 0x221   : > { %v691_v11 = vadd.f32 1e-05, %v690_v9 }
 0x223   : > { %2334 = vrsqrt.f32 %v691_v11 }
 0x22d   : > { %v2335_v16 = vpop.eup %2334 }
 0x22e   : > { %v693_v18 = vmul.f32 %v2335_v16, %v686_v6 }
 0x230   : > { %v698_v19 = vmul.f32 %v697_v15, %v693_v18 }
 0x232   : > { %v703_v20 = vadd.f32 %v702_v17, %v698_v19 }
 0x234   : > { %704 = vst [vmem:[%s3519_s25] sm:$0xff] %v703_v20 }
 0x235 PF: > { %s3520_s30 = sld [smem:[#allocation31_spill]]  ;;  %v2336_v22 = vld [vmem:[%s3183_s28] sm:$0xff]   ;;  %v2337_v23 = vld [vmem:[%s3155_s24] sm:$0xff]   ;;  %v2338_v24 = vld [vmem:[%s3183_s28 + $0x8] sm:$0xff]   ;;  %v2732_v25 = vmov 0.0   ;;  %vm2733_vm0 = vmmov 0   ;;  %v727_v45 = vlaneseq }
 0x236   : > { %2144 = vmatprep.subr.bf16.mxu0 %v2732_v25  ;;  %2164 = vmatprep.subr.bf16.mxu1 %v2732_v25  ;;  %v2339_v30 = vld [vmem:[%s3155_s24 + $0x8] sm:$0xff]   ;;  %v2340_v31 = vld [vmem:[%s3183_s28 + $0x10] sm:$0xff]   ;;  %v2341_v32 = vld [vmem:[%s3155_s24 + $0x10] sm:$0xff]   ;;  %s2735_s12 = smov [#allocation14]  }
 0x237   : > { %2145 = vmatpush3.bf16.msra.mxu0 %v2336_v22  ;;  %2165 = vmatpush3.bf16.msra.mxu1 %v2337_v23  ;;  %v2342_v33 = vld [vmem:[%s3183_s28 + $0x18] sm:$0xff]   ;;  %v2343_v34 = vld [vmem:[%s3155_s24 + $0x18] sm:$0xff]   ;;  %v2344_v35 = vld [vmem:[%s3183_s28 + $0x20] sm:$0xff]   ;;  %v3254_v47 = vshrl.u32 %v727_v45, 7  ;;  %s2644_s13 = sshll.u32 %s2735_s12, 4  ;;  %s2645_s13 = int_to_ptr.vmem [resolvable:$false] %s2644_s13 }
 0x238   : > { %2146 = vmatprep.subr.bf16.mxu0 %v2732_v25  ;;  %2166 = vmatprep.subr.bf16.mxu1 %v2732_v25  ;;  %v2345_v36 = vld [vmem:[%s3155_s24 + $0x20] sm:$0xff]   ;;  %v2346_v37 = vld [vmem:[%s3183_s28 + $0x28] sm:$0xff]   ;;  %v2347_v38 = vld [vmem:[%s3155_s24 + $0x28] sm:$0xff]  }
 0x239   : > { %v2348_v39 = vld [vmem:[%s3183_s28 + $0x30] sm:$0xff]   ;;  %v2349_v40 = vld [vmem:[%s3155_s24 + $0x30] sm:$0xff]   ;;  %2160 = vmatprep.mubr.msk.bf16.mxu0 %vm2733_vm0, %v2732_v25  ;;  %2180 = vmatprep.mubr.msk.bf16.mxu1 %vm2733_vm0, %v2732_v25  ;;  %v2350_v41 = vld [vmem:[%s3183_s28 + $0x38] sm:$0xff]   ;;  %v729_v48 = vsub.s32 2, %v3254_v47  ;;  %v734_v49 = vsub.s32 3, %v3254_v47  ;;  %v744_v50 = vsub.s32 1, %v3254_v47 }
 0x23a   : > { %v2351_v42 = vld [vmem:[%s3155_s24 + $0x38] sm:$0xff]   ;;  %v739_v52 = vsub.s32 0, %v3254_v47  ;;  %v1989_v58 = vld [vmem:[%s3147_s6 + $0x18] sm:$0xff]  ;;  %v2352_v8 = vld [vmem:[%s3161_s19] sm:$0xff]   ;;  %v761_v15 = vsub.s32 4, %v3254_v47  ;;  %v766_v16 = vsub.s32 5, %v3254_v47 }
 0x23b   : > { %v3212_v21 = vld [vmem:[%s3520_s30] sm:$0xff]  ;;  %2147 = vmatpush3.bf16.msra.mxu0 %v2338_v24  ;;  %2167 = vmatpush3.bf16.msra.mxu1 %v2339_v30  ;;  %v730_v51 = vrot.slane %v3188_v0, %v729_v48  ;;  %v735_v55 = vrot.slane %v3188_v0, %v734_v49  ;;  %v745_v56 = vrot.slane %v3190_v1, %v744_v50  ;;  %v2353_v11 = vld [vmem:[%s3161_s19 + $0x8] sm:$0xff]   ;;  %v2355_v13 = vld [vmem:[%s3161_s19 + $0x18] sm:$0xff]   ;;  %s2067_s24 = sshll.u32 %s2820_s21, 7  ;;  %s1710_s28 = scalar_lea.sflag [#allocation4], %s3141_s29 }
 0x23c   : > { %715 = vadd.xlane.f32.xlu0 %v3212_v21  ;;  %2148 = vmatprep.subr.bf16.mxu0 %v2732_v25  ;;  %v756_v57 = vrot.slane %v3190_v1, %v734_v49  ;;  %v740_v60 = vrot.slane %v3190_v1, %v739_v52  ;;  %v751_v61 = vrot.slane %v3190_v1, %v729_v48  ;;  %v2354_v12 = vld [vmem:[%s3161_s19 + $0x10] sm:$0xff]   ;;  %v2356_v14 = vld [vmem:[%s3161_s19 + $0x20] sm:$0xff]   ;;  %v2357_v17 = vld [vmem:[%s3161_s19 + $0x28] sm:$0xff]   ;;  %s2646_s21 = scalar_lea.vmem %s2645_s13, 1280 }
 0x23d   : > { %2168 = vmatprep.subr.bf16.mxu1 %v2732_v25  ;;  %v746_v63 = vmul.f32 %v1989_v58, %v745_v56  ;;  %v762_v18 = vrot.slane %v3190_v1, %v761_v15  ;;  %v767_v19 = vrot.slane %v3190_v1, %v766_v16  ;;  %v2358_v20 = vld [vmem:[%s3161_s19 + $0x30] sm:$0xff]   ;;  %v2359_v24 = vld [vmem:[%s3161_s19 + $0x38] sm:$0xff]   ;;  %s1725_s19 = sshll.u32 %s3198_s11, 4  ;;  %s3410_s19 = int_to_ptr.vmem [resolvable:$true] %s1725_s19 }
 0x23e   : > { %v757_v3 = vmul.f32 %v1989_v58, %v756_v57  ;;  %v2362_v30 = vld [vmem:[%s3163_s22 + $0x10] sm:$0xff]   ;;  %s2640_s4 = scalar_lea.vmem %s3410_s19, 640  ;;  %p2647_p4 = scmp.lt.s32.totalorder %s3410_s19, %s2645_s13 }
 0x23f   : > { %2149 = vmatpush3.bf16.msra.mxu0 %v2340_v31  ;;  %2169 = vmatpush3.bf16.msra.mxu1 %v2341_v32  ;;  %v768_v23 = vmul.f32 %v1989_v58, %v767_v19  ;;  %v2363_v31 = vld [vmem:[%s3163_s22 + $0x18] sm:$0xff]   ;;  %v2364_v32 = vld [vmem:[%s3163_s22 + $0x20] sm:$0xff]   ;;  %p2641_p9 = scmp.ne.s32.totalorder %s3410_s19, %s2640_s4  ;;  %p2648_p0 = scmp.lt.s32.totalorder %s2646_s21, %s2640_s4 }
 0x240   : > { %2150 = vmatprep.subr.bf16.mxu0 %v2732_v25  ;;  %2170 = vmatprep.subr.bf16.mxu1 %v2732_v25 }
 0x241   : > { %p2649_p2 = por %p2648_p0, %p2647_p4 }
 0x243   : > { %2151 = vmatpush3.bf16.msra.mxu0 %v2342_v33  ;;  %2171 = vmatpush3.bf16.msra.mxu1 %v2343_v34  ;;  %v2365_v33 = vld [vmem:[%s3163_s22 + $0x28] sm:$0xff]   ;;  %v2366_v34 = vld [vmem:[%s3163_s22 + $0x30] sm:$0xff]  }
 0x244   : > { %2152 = vmatprep.subr.bf16.mxu0 %v2732_v25  ;;  %2172 = vmatprep.subr.bf16.mxu1 %v2732_v25 }
 0x247   : > { %2153 = vmatpush3.bf16.msra.mxu0 %v2344_v35  ;;  %2173 = vmatpush3.bf16.msra.mxu1 %v2345_v36  ;;  %v2367_v35 = vld [vmem:[%s3163_s22 + $0x38] sm:$0xff]   ;;  %v1109_v36 = vsub.s32 6, %v3254_v47 }
 0x248   : > { %2154 = vmatprep.subr.bf16.mxu0 %v2732_v25  ;;  %2174 = vmatprep.subr.bf16.mxu1 %v2732_v25 }
 0x24b   : > { %2155 = vmatpush3.bf16.msra.mxu0 %v2346_v37  ;;  %2175 = vmatpush3.bf16.msra.mxu1 %v2347_v38  ;;  %v1092_v37 = vsub.s32 7, %v3254_v47  ;;  %v1110_v38 = vrot.slane %v3188_v0, %v1109_v36  ;;  %v2402_v47 = vld [vmem:[%s3194_s27 + $0x48] sm:$0xff]  }
 0x24c   : > { %2156 = vmatprep.subr.bf16.mxu0 %v2732_v25  ;;  %2176 = vmatprep.subr.bf16.mxu1 %v2732_v25 }
 0x24f   : > { %2157 = vmatpush3.bf16.msra.mxu0 %v2348_v39  ;;  %2177 = vmatpush3.bf16.msra.mxu1 %v2349_v40  ;;  %v1988_v39 = vld [vmem:[%s3147_s6 + $0x10] sm:$0xff]  ;;  %v1093_v40 = vrot.slane %v3188_v0, %v1092_v37 }
 0x250   : > { %2158 = vmatprep.subr.bf16.mxu0 %v2732_v25  ;;  %2178 = vmatprep.subr.bf16.mxu1 %v2732_v25 }
 0x253   : > { %2159 = vmatpush3.bf16.msra.mxu0 %v2350_v41  ;;  %2179 = vmatpush3.bf16.msra.mxu1 %v2351_v42  ;;  %v1111_v41 = vadd.f32 %v1988_v39, %v1110_v38 }
 0x254   : > { %2184 = vmatprep.subr.bf16.mxu0 %v2732_v25  ;;  %2204 = vmatprep.subr.bf16.mxu1 %v2732_v25 }
 0x2c9   : > { %v716_v26 = vpop.xlane.xlu0 %715 }
 0x2ca   : > { %v718_v27 = vmul.f32 0.0078125, %v716_v26 }
 0x2cc   : > { %v719_v28 = vsub.f32 %v3212_v21, %v718_v27 }
 0x2ce   : > { %v720_v29 = vmul.f32 %v719_v28, %v719_v28 }
 0x2d0   : > { %721 = vadd.xlane.f32.xlu0 %v720_v29  ;;  %v2361_v29 = vld [vmem:[%s3163_s22 + $0x8] sm:$0xff]  }
 0x35d   : > { %v722_v43 = vpop.xlane.xlu0 %721 }
 0x35e   : > { %v723_v44 = vmul.f32 0.0078125, %v722_v43 }
 0x360   : > { %v724_v46 = vadd.f32 1e-05, %v723_v44 }
 0x362   : > { %2416 = vrsqrt.f32 %v724_v46 }
 0x36c   : > { %v2417_v53 = vpop.eup %2416 }
 0x36d   : > { %v726_v54 = vmul.f32 %v2417_v53, %v719_v28  ;;  %v2360_v28 = vld [vmem:[%s3163_s22] sm:$0xff]  }
 0x36f   : > { %v731_v59 = vmul.f32 %v730_v51, %v726_v54 }
 0x371   : > { %v736_v62 = vadd.f32 %v735_v55, %v731_v59 }
 0x373   : > { %v741_v4 = vmul.f32 %v740_v60, %v736_v62  ;;  %2065 = vst [vmem:[%s3198_s11 + $0x18] sm:$0xff] %v736_v62  ;;  %v752_v5 = vmul.f32 %v751_v61, %v736_v62  ;;  %v763_v22 = vmul.f32 %v762_v18, %v736_v62 }
 0x375   : > { %v747_v6 = vadd.f32 %v746_v63, %v741_v4  ;;  %v758_v7 = vadd.f32 %v757_v3, %v752_v5  ;;  %v769_v26 = vadd.f32 %v768_v23, %v763_v22  ;;  %v1987_v3 = vld [vmem:[%s3147_s6 + $0x8] sm:$0xff]  ;;  %v706_v4 = vld [vmem:[%s3147_s6] sm:$0xff] }
 0x377   : > { %v786_v9 = vpack.c.bf16 %v747_v6, %v747_v6  ;;  %v891_v10 = vpack.c.bf16 %v758_v7, %v758_v7  ;;  %v996_v27 = vpack.c.bf16 %v769_v26, %v769_v26 }
 0x379   : > { %2161 = vmatmul.mubr.bf16.vlgmr.msra.gmra.mrb[0].mxu0 %v786_v9  ;;  %2181 = vmatmul.mubr.bf16.vlgmr.msra.gmra.mrb[0].mxu1 %v891_v10 }
 0x37a   : > { %2185 = vmatpush3.bf16.msra.mxu0 %v2352_v8  ;;  %2200 = vmatprep.mubr.msk.bf16.mxu0 %vm2733_vm0, %v2732_v25 }
 0x37b   : > { %2186 = vmatprep.subr.bf16.mxu0 %v2732_v25  ;;  %2220 = vmatprep.mubr.msk.bf16.mxu1 %vm2733_vm0, %v2732_v25 }
 0x37c   : > { %2205 = vmatpush3.bf16.msra.mxu1 %v2360_v28 }
 0x37d   : > { %2206 = vmatprep.subr.bf16.mxu1 %v2732_v25 }
 0x37e   : > { %2187 = vmatpush3.bf16.msra.mxu0 %v2353_v11 }
 0x37f   : > { %2188 = vmatprep.subr.bf16.mxu0 %v2732_v25 }
 0x380   : > { %2207 = vmatpush3.bf16.msra.mxu1 %v2361_v29 }
 0x381   : > { %2208 = vmatprep.subr.bf16.mxu1 %v2732_v25 }
 0x382   : > { %2189 = vmatpush3.bf16.msra.mxu0 %v2354_v12 }
 0x383   : > { %2190 = vmatprep.subr.bf16.mxu0 %v2732_v25 }
 0x384   : > { %2209 = vmatpush3.bf16.msra.mxu1 %v2362_v30 }
 0x385   : > { %2210 = vmatprep.subr.bf16.mxu1 %v2732_v25 }
 0x386   : > { %2191 = vmatpush3.bf16.msra.mxu0 %v2355_v13 }
 0x387   : > { %2192 = vmatprep.subr.bf16.mxu0 %v2732_v25 }
 0x388   : > { %2211 = vmatpush3.bf16.msra.mxu1 %v2363_v31 }
 0x389   : > { %2212 = vmatprep.subr.bf16.mxu1 %v2732_v25 }
 0x38a   : > { %2193 = vmatpush3.bf16.msra.mxu0 %v2356_v14 }
 0x38b   : > { %2194 = vmatprep.subr.bf16.mxu0 %v2732_v25 }
 0x38c   : > { %2213 = vmatpush3.bf16.msra.mxu1 %v2364_v32 }
 0x38d   : > { %2214 = vmatprep.subr.bf16.mxu1 %v2732_v25 }
 0x38e   : > { %2195 = vmatpush3.bf16.msra.mxu0 %v2357_v17 }
 0x38f   : > { %2196 = vmatprep.subr.bf16.mxu0 %v2732_v25 }
 0x390   : > { %2215 = vmatpush3.bf16.msra.mxu1 %v2365_v33 }
 0x391   : > { %2216 = vmatprep.subr.bf16.mxu1 %v2732_v25 }
 0x392   : > { %2197 = vmatpush3.bf16.msra.mxu0 %v2358_v20 }
 0x393   : > { %2198 = vmatprep.subr.bf16.mxu0 %v2732_v25 }
 0x394   : > { %2217 = vmatpush3.bf16.msra.mxu1 %v2366_v34 }
 0x395   : > { %2218 = vmatprep.subr.bf16.mxu1 %v2732_v25 }
 0x396   : > { %2199 = vmatpush3.bf16.msra.mxu0 %v2359_v24 }
 0x397   : > { %2224 = vmatprep.subr.bf16.mxu0 %v2732_v25 }
 0x398   : > { %2219 = vmatpush3.bf16.msra.mxu1 %v2367_v35 }
 0x399   : > { %2201 = vmatmul.mubr.bf16.vlgmr.msra.gmra.mrb[4].mxu0 %v996_v27 }
 0x39a   : > { %2240 = vmatprep.mubr.msk.bf16.mxu0 %vm2733_vm0, %v2732_v25 }
 0x44c   : > { %v869_v42 = vpop.f32.mrb[0].mxu0  ;;  %v974_v43 = vpop.f32.mrb[0].mxu1 }
 0x44d   : > { %v1094_v44 = vadd.f32 %v1093_v40, %v869_v42  ;;  %v1112_v45 = vmax.f32 %v1111_v41, %v869_v42  ;;  %v2162_v46 = vpop.f32.mrb[1].mxu0  ;;  %v2182_v48 = vpop.f32.mrb[1].mxu1 }
 0x44e   : > { %v872_v49 = vpop.f32.mrb[2].mxu0  ;;  %v977_v51 = vpop.f32.mrb[2].mxu1 }
 0x44f   : > { %v1095_v53 = vmax.f32 %v1988_v39, %v1094_v44  ;;  %v1113_v54 = vsub.f32 %v1111_v41, %v1112_v45  ;;  %v1116_v55 = vsub.f32 %v869_v42, %v1112_v45  ;;  %2064 = vst [vmem:[%s3198_s11 + $0x10] sm:$0xff] %v1112_v45  ;;  %v2163_v56 = vpop.f32.mrb[3].mxu0  ;;  %v2183_v57 = vpop.f32.mrb[3].mxu1  ;;  %v2368_v42 = vld [vmem:[%s3170_s0] ss:$8 sps:$4 sm:$0xff]  }
 0x450   : > { %v2374_v45 = vld [vmem:[%s3170_s0 + $0x14] ss:$8 sps:$4 sm:$0xff]  }
 0x451   : > { %v1096_v58 = vsub.f32 %v1988_v39, %v1095_v53  ;;  %v1099_v59 = vsub.f32 %v1094_v44, %v1095_v53  ;;  %v1114_v60 = vmul.f32 1.442695, %v1113_v54  ;;  %v1117_v61 = vmul.f32 1.442695, %v1116_v55  ;;  %v2371_v44 = vld [vmem:[%s3172_s26] sm:$0xff]   ;;  %v2375_v53 = vld [vmem:[%s3172_s26 + $0x8] sm:$0xff]  }
 0x452   : > { %2225 = vmatpush3.bf16.msra.mxu0 %v2371_v44  ;;  %v2378_v54 = vld [vmem:[%s3170_s0 + $0x24] ss:$8 sps:$4 sm:$0xff]   ;;  %v2376_v55 = vld [vmem:[%s3170_s0 + $0x20] ss:$8 sps:$4 sm:$0xff]   ;;  %v2379_v56 = vld [vmem:[%s3172_s26 + $0x10] sm:$0xff]  }
 0x453   : > { %v1097_v62 = vmul.f32 1.442695, %v1096_v58  ;;  %v1100_v63 = vmul.f32 1.442695, %v1099_v59  ;;  %2418 = vpow2.f32 %v1114_v60  ;;  %2226 = vmatprep.subr.bf16.mxu0 %v2732_v25  ;;  %v2382_v57 = vld [vmem:[%s3170_s0 + $0x34] ss:$8 sps:$4 sm:$0xff]  }
 0x454   : > { %2420 = vpow2.f32 %v1117_v61  ;;  %v2380_v58 = vld [vmem:[%s3170_s0 + $0x30] ss:$8 sps:$4 sm:$0xff]   ;;  %v2386_v60 = vld [vmem:[%s3170_s0 + $0x44] ss:$8 sps:$4 sm:$0xff]   ;;  %v2384_v61 = vld [vmem:[%s3170_s0 + $0x40] ss:$8 sps:$4 sm:$0xff]  }
 0x455   : > { %2422 = vpow2.f32 %v1097_v62  ;;  %v2383_v59 = vld [vmem:[%s3172_s26 + $0x18] sm:$0xff]   ;;  %v2387_v62 = vld [vmem:[%s3172_s26 + $0x20] sm:$0xff]  }
 0x456   : > { %2424 = vpow2.f32 %v1100_v63  ;;  %2227 = vmatpush3.bf16.msra.mxu0 %v2375_v53  ;;  %v2390_v63 = vld [vmem:[%s3170_s0 + $0x54] ss:$8 sps:$4 sm:$0xff]  }
 0x457   : > { %2228 = vmatprep.subr.bf16.mxu0 %v2732_v25  ;;  %v2414_v44 = vld [vmem:[%s3194_s27 + $0x78] sm:$0xff]  }
 0x45a   : > { %2229 = vmatpush3.bf16.msra.mxu0 %v2379_v56 }
 0x45b   : > { %2230 = vmatprep.subr.bf16.mxu0 %v2732_v25 }
 0x45d   : > { %v2419_v5 = vpop.eup %2418 }
 0x45e   : > { %v2421_v6 = vpop.eup %2420  ;;  %v1122_v7 = vmul.f32 %v2419_v5, %v1987_v3  ;;  %v1119_v8 = vmul.f32 %v2419_v5, %v706_v4  ;;  %2231 = vmatpush3.bf16.msra.mxu0 %v2383_v59  ;;  %v2392_v5 = vld [vmem:[%s3170_s0 + $0x60] ss:$8 sps:$4 sm:$0xff]  }
 0x45f   : > { %v2423_v9 = vpop.eup %2422  ;;  %v1120_v10 = vmul.f32 %v2421_v6, %v974_v43  ;;  %2232 = vmatprep.subr.bf16.mxu0 %v2732_v25 }
 0x460   : > { %v2425_v11 = vpop.eup %2424  ;;  %v1123_v12 = vadd.f32 %v2421_v6, %v1122_v7  ;;  %v1102_v13 = vmul.f32 %v2423_v9, %v706_v4  ;;  %v1105_v19 = vmul.f32 %v2423_v9, %v1987_v3  ;;  %v2388_v3 = vld [vmem:[%s3170_s0 + $0x50] ss:$8 sps:$4 sm:$0xff]   ;;  %v2391_v4 = vld [vmem:[%s3172_s26 + $0x28] sm:$0xff]   ;;  %v2734_v9 = vmov 0  }
 0x461   : > { %v1103_v14 = vmul.f32 %v2425_v11, %v974_v43  ;;  %v1121_v17 = vadd.f32 %v1120_v10, %v1119_v8  ;;  %v2370_v43 = vld [vmem:[%s3170_s0 + $0x4] ss:$8 sps:$4 sm:$0xff]   ;;  %v2395_v7 = vld [vmem:[%s3172_s26 + $0x30] sm:$0xff]  }
 0x462   : > { %2063 = vst [vmem:[%s3198_s11 + $0x8] sm:$0xff] %v1123_v12  ;;  %v1106_v20 = vadd.f32 %v2425_v11, %v1105_v19  ;;  %1482 = vmatprep.subr.bf16.mxu1 %v2370_v43  ;;  %2233 = vmatpush3.bf16.msra.mxu0 %v2387_v62  ;;  %v2394_v6 = vld [vmem:[%s3170_s0 + $0x64] ss:$8 sps:$4 sm:$0xff]   ;;  %v2398_v8 = vld [vmem:[%s3170_s0 + $0x74] ss:$8 sps:$4 sm:$0xff]  }
 0x463   : > { %v1104_v18 = vadd.f32 %v1103_v14, %v1102_v13  ;;  %1700 = vst [vmem:[%s3198_s11] sm:$0xff] %v1121_v17  ;;  %2234 = vmatprep.subr.bf16.mxu0 %v2732_v25  ;;  %v2396_v10 = vld [vmem:[%s3170_s0 + $0x70] ss:$8 sps:$4 sm:$0xff]   ;;  %v2400_v12 = vld [vmem:[%s3194_s27 + $0x40] sm:$0xff]  }
 0x464   : > { %2426 = vrcp.f32 %v1106_v20  ;;  %v2399_v11 = vld [vmem:[%s3172_s26 + $0x38] sm:$0xff]   ;;  %v1262_v20 = vrot.slane %v3190_v1, %v1092_v37  ;;  %v2413_v43 = vld [vmem:[%s3194_s27 + $0x30] sm:$0xff]   ;;  %s3522_s26 = sld [smem:[#allocation32_spill]] }
 0x466   : > { %2235 = vmatpush3.bf16.msra.mxu0 %v2391_v4 }
 0x467   : > { %2236 = vmatprep.subr.bf16.mxu0 %v2732_v25 }
 0x46a   : > { %2237 = vmatpush3.bf16.msra.mxu0 %v2395_v7  ;;  %s3408_s8 = scalar_lea.hbm %s3522_s26, %s2067_s24 }
 0x46b   : > { %2238 = vmatprep.subr.bf16.mxu0 %v2732_v25  ;;  %v1252_v25 = vrot.slane %v3188_v0, %v766_v16 }
 0x46c   : > { %v1079_v22 = vpop.f32.mrb[4].mxu0 }
 0x46d   : > { %v1086_v23 = vmul.f32 0.16666667, %v1079_v22  ;;  %v2202_v24 = vpop.f32.mrb[5].mxu0 }
 0x46e   : > { %v1082_v26 = vpop.f32.mrb[6].mxu0  ;;  %v2427_v32 = vpop.eup %2426  ;;  %2239 = vmatpush3.bf16.msra.mxu0 %v2399_v11  ;;  %v1990_v24 = vld [vmem:[%s3147_s6 + $0x20] sm:$0xff]  ;;  %s3521_s6 = sld [smem:[#allocation24_spill]] }
 0x46f   : > { %v1087_v27 = vadd.f32 0.5, %v1086_v23  ;;  %v2203_v28 = vpop.f32.mrb[7].mxu0  ;;  %2122 = vmatprep.subr.bf16.mxu0 %v2400_v12  ;;  %v1273_v23 = vrot.slane %v3192_v2, %v744_v50  ;;  %v1263_v37 = vmul.f32 %v1990_v24, %v1262_v20 }
 0x471   : > { %v1088_v29 = vmax.f32 %v1087_v27, 0.0  ;;  %v1274_v27 = vmul.f32 %v1990_v24, %v1273_v23 }
 0x473   : > { %v1089_v30 = vmin.f32 %v1088_v29, 1.0 }
 0x474   : > { %p3523_p11 = scmp.ne.s32.totalorder %s3521_s6, 0 }
 0x475   : > { %v1124_v31 = vmul.f32 %v1104_v18, %v1089_v30  ;;  %v1247_v18 = vrot.slane %v3188_v0, %v761_v15  ;;  %v1257_v15 = vrot.slane %v3190_v1, %v1109_v36  ;;  %v1268_v0 = vrot.slane %v3192_v2, %v739_v52  ;;  %v2403_v2 = vld [vmem:[%s3194_s27 + $0x8] sm:$0xff]   ;;  %v2404_v52 = vld [vmem:[%s3194_s27 + $0x50] sm:$0xff]  }
 0x476   : > { %p2642_p8 = pnand %p2641_p9, %p3523_p11 }
 0x477   : > { %v1126_v33 = vmul.f32 %v2427_v32, %v1124_v31  ;;  %v2401_v31 = vld [vmem:[%s3194_s27] sm:$0xff]   ;;  %v2405_v32 = vld [vmem:[%s3194_s27 + $0x10] sm:$0xff]  }
 0x478   : > { %p2643_p7 = pneg %p2642_p8 }
 0x479   : > { %v1143_v34 = vpack.c.bf16 %v1126_v33, %v1126_v33  ;;  %v2406_v33 = vld [vmem:[%s3194_s27 + $0x58] sm:$0xff]  }
 0x47a   : > { %p2650_p5 = pnand %p2649_p2, %p2643_p7 }
 0x47b   : > { %2221 = vmatmul.mubr.bf16.vlgmr.msra.gmra.mrb[4].mxu1 %v1143_v34  ;;  %v2407_v34 = vld [vmem:[%s3194_s27 + $0x18] sm:$0xff]  }
 0x47c   : > { %1483 = vmatpush1.bf16.msra.mxu1 %v2368_v42  ;;  %1514 = vmatprep.mubr.bf16.mxu1 %v2734_v9  ;;  %v2412_v42 = vld [vmem:[%s3194_s27 + $0x70] sm:$0xff]  }
 0x47d   : > { %1484 = vmatprep.subr.bf16.mxu1 %v2374_v45  ;;  %v2415_v45 = vld [vmem:[%s3194_s27 + $0x38] sm:$0xff]  }
 0x54e   : > { %v1226_v35 = vpop.f32.mrb[4].mxu1 }
 0x54f   : > { %v3332_v38 = vadd.f32 %v1226_v35, %v3212_v21  ;;  %v2222_v39 = vpop.f32.mrb[5].mxu1  ;;  %v2372_v21 = vld [vmem:[%s3170_s0 + $0x10] ss:$8 sps:$4 sm:$0xff]   ;;  %v2408_v35 = vld [vmem:[%s3194_s27 + $0x60] sm:$0xff]  }
 0x550   : > { %v1229_v40 = vpop.f32.mrb[6].mxu1  ;;  %1485 = vmatpush1.bf16.msra.mxu1 %v2372_v21  ;;  %v2409_v39 = vld [vmem:[%s3194_s27 + $0x20] sm:$0xff]  }
 0x551   : > { %1233 = vadd.xlane.f32.xlu1 %v3332_v38  ;;  %v2223_v41 = vpop.f32.mrb[7].mxu1  ;;  %1486 = vmatprep.subr.bf16.mxu1 %v2378_v54  ;;  %v2410_v40 = vld [vmem:[%s3194_s27 + $0x68] sm:$0xff]  }
 0x552   : > { %v2411_v41 = vld [vmem:[%s3194_s27 + $0x28] sm:$0xff]  }
 0x554   : > { %1487 = vmatpush1.bf16.msra.mxu1 %v2376_v55 }
 0x555   : > { %1488 = vmatprep.subr.bf16.mxu1 %v2382_v57 }
 0x558   : > { %1489 = vmatpush1.bf16.msra.mxu1 %v2380_v58 }
 0x559   : > { %1490 = vmatprep.subr.bf16.mxu1 %v2386_v60 }
 0x55c   : > { %1491 = vmatpush1.bf16.msra.mxu1 %v2384_v61 }
 0x55d   : > { %1492 = vmatprep.subr.bf16.mxu1 %v2390_v63 }
 0x560   : > { %1493 = vmatpush1.bf16.msra.mxu1 %v2388_v3 }
 0x561   : > { %1494 = vmatprep.subr.bf16.mxu1 %v2394_v6 }
 0x564   : > { %1495 = vmatpush1.bf16.msra.mxu1 %v2392_v5 }
 0x565   : > { %1496 = vmatprep.subr.bf16.mxu1 %v2398_v8 }
 0x568   : > { %1497 = vmatpush1.bf16.msra.mxu1 %v2396_v10 }
 0x5de   : > { %v1234_v46 = vpop.xlane.xlu1 %1233 }
 0x5df   : > { %v1235_v48 = vmul.f32 0.0078125, %v1234_v46 }
 0x5e1   : > { %v1236_v49 = vsub.f32 %v3332_v38, %v1235_v48 }
 0x5e3   : > { %v1237_v51 = vmul.f32 %v1236_v49, %v1236_v49 }
 0x5e5   : > { %1238 = vadd.xlane.f32.xlu1 %v1237_v51 }
 0x672   : > { %v1239_v13 = vpop.xlane.xlu1 %1238 }
 0x673   : > { %v1240_v14 = vmul.f32 0.0078125, %v1239_v13 }
 0x675   : > { %v1241_v17 = vadd.f32 1e-05, %v1240_v14 }
 0x677   : > { %2428 = vrsqrt.f32 %v1241_v17 }
 0x681   : > { %v2429_v19 = vpop.eup %2428 }
 0x682   : > { %v1243_v22 = vmul.f32 %v2429_v19, %v1236_v49 }
 0x684   : > { %v1248_v26 = vmul.f32 %v1247_v18, %v1243_v22 }
 0x686   : > { %v1253_v16 = vadd.f32 %v1252_v25, %v1248_v26 }
 0x688   : > { %v1269_v28 = vmul.f32 %v1268_v0, %v1253_v16  ;;  %2066 = vst [vmem:[%s3198_s11 + $0x20] sm:$0xff] %v1253_v16  ;;  %v1258_v50 = vmul.f32 %v1257_v15, %v1253_v16 }
 0x68a   : > { %v1275_v29 = vadd.f32 %v1274_v27, %v1269_v28  ;;  %v1264_v30 = vadd.f32 %v1263_v37, %v1258_v50 }
 0x68c   : > { %v1292_v1 = vpack.c.bf16 %v1275_v29, %v1275_v29  ;;  %v1401_v36 = vpack.c.bf16 %v1264_v30, %v1264_v30 }
 0x68e   : > { %2241 = vmatmul.mubr.bf16.vlgmr.msra.gmra.mrb[8].mxu0 %v1292_v1  ;;  %1515 = vmatmul.mubr.bf16.vlgmr.msra.gmra.mrb[8].mxu1 %v1401_v36 }
 0x68f   : > { %2123 = vmatpush3.bf16.msra.mxu0 %v2401_v31 }
 0x690   : > { %2124 = vmatprep.subr.bf16.mxu0 %v2402_v47 }
 0x693   : > { %2125 = vmatpush3.bf16.msra.mxu0 %v2403_v2 }
 0x694   : > { %2126 = vmatprep.subr.bf16.mxu0 %v2404_v52 }
 0x697   : > { %2127 = vmatpush3.bf16.msra.mxu0 %v2405_v32 }
 0x698   : > { %2128 = vmatprep.subr.bf16.mxu0 %v2406_v33 }
 0x69b   : > { %2129 = vmatpush3.bf16.msra.mxu0 %v2407_v34 }
 0x69c   : > { %2130 = vmatprep.subr.bf16.mxu0 %v2408_v35 }
 0x69f   : > { %2131 = vmatpush3.bf16.msra.mxu0 %v2409_v39 }
 0x6a0   : > { %2132 = vmatprep.subr.bf16.mxu0 %v2410_v40 }
 0x6a3   : > { %2133 = vmatpush3.bf16.msra.mxu0 %v2411_v41 }
 0x6a4   : > { %2134 = vmatprep.subr.bf16.mxu0 %v2412_v42 }
 0x6a7   : > { %2135 = vmatpush3.bf16.msra.mxu0 %v2413_v43 }
 0x6a8   : > { %2136 = vmatprep.subr.bf16.mxu0 %v2414_v44 }
 0x6ab   : > { %2137 = vmatpush3.bf16.msra.mxu0 %v2415_v45 }
 0x761   : > { %v1375_v21 = vpop.f32.mrb[8].mxu0  ;;  %v1516_v46 = vpop.f32.mrb[8].mxu1 }
 0x762   : > { %v1523_v48 = vmax.f32 %v1516_v46, 0.0  ;;  %v2242_v49 = vpop.f32.mrb[9].mxu0  ;;  %v1518_v51 = vpop.f32.mrb[9].mxu1 }
 0x763   : > { %v1524_v53 = vmax.f32 %v1518_v51, 0.0  ;;  %v1378_v54 = vpop.f32.mrb[10].mxu0  ;;  %v1520_v55 = vpop.f32.mrb[10].mxu1 }
 0x764   : > { %v1525_v56 = vmul.f32 %v1523_v48, %v1523_v48  ;;  %v2243_v57 = vpop.f32.mrb[11].mxu0  ;;  %v1521_v58 = vpop.f32.mrb[11].mxu1 }
 0x765   : > { %v1526_v59 = vmul.f32 %v1524_v53, %v1524_v53 }
 0x766   : > { %v1559_v61 = vpack.c.bf16 %v1525_v56, %v1525_v56 }
 0x767   : > { %v1560_v60 = vpack.c.bf16 %v1526_v59, %v1526_v59 }
 0x769   : > { %1689 = vmatprep.mubr.bf16.mxu0 %v1560_v60 }
 0x76a   : > { %1690 = vmatmul.mubr.bf16.vlgmr.msra.gmra.mrb[12].mxu0 %v1559_v61 }
 0x76b   : > { %2653 = shalt.err (!%p2650_p5)
}
 0x76c   : > { %s2654_s27 = scalar_lea.hbm %s3408_s8, 640  ;;  %s2658_s1 = scalar_lea.hbm %s3522_s26, 2560 }
 0x76d   : > { %p2655_p13 = scmp.ne.s32.totalorder %s3408_s8, %s2654_s27  ;;  %p2659_p10 = scmp.lt.u32.totalorder %s3408_s8, %s3522_s26 }
 0x76e   : > { %p2660_p12 = scmp.lt.u32.totalorder %s2658_s1, %s2654_s27  ;;  %p2662_p9 = scmp.lt.u32.totalorder %s2654_s27, %s3408_s8 }
 0x76f   : > { %p2656_p6 = pnand %p2655_p13, %p3523_p11 }
 0x770   : > { %p2661_p3 = por %p2660_p12, %p2659_p10 }
 0x771   : > { %p2657_p1 = pneg %p2656_p6 }
 0x772   : > { %p2663_p8 = por %p2662_p9, %p2661_p3 }
 0x774   : > { %p2664_p7 = pnand %p2663_p8, %p2657_p1 }
 0x776   : > { %2667 = shalt.err (!%p2664_p7)
}
 0x777   : > { %s2736_s15 = smov 128   ;;  %s2737_s25 = smov 512   ;;  %v1381_v62 = vmul.f32 0.16666667, %v1375_v21 }
 0x778   : > { %s2738_s14 = smov 8  }
 0x779   : > { %2261 = dma.vmem_to_hbm [thread:$0]  (%p3523_p11), %s3410_s19, 640, %s3408_s8, %s1710_s28, %s2736_s15, %s2737_s25, %s2738_s14   ;;  %v1382_v63 = vadd.f32 0.5, %v1381_v62 }
 0x77b   : > { %v1383_v3 = vmax.f32 %v1382_v63, 0.0 }
 0x77d   : > { %v1384_v6 = vmin.f32 %v1383_v3, 1.0 }
 0x83d   : > { %v2138_v4 = vpop.f32.mrb[12].mxu0 }
 0x83e   : > { %v2139_v5 = vpop.f32.mrb[13].mxu0 }
 0x83f   : > { %v2140_v7 = vadd.f32 %v2139_v5, %v2138_v4  ;;  %v2141_v8 = vpop.f32.mrb[14].mxu0 }
 0x840   : > { %v2142_v9 = vpop.f32.mrb[15].mxu0 }
 0x841   : > { %v1697_v10 = vmul.f32 %v2140_v7, %v1384_v6 }
 0x843   : > { %v1698_v11 = vadd.f32 %v1697_v10, %v3332_v38 }
 0x845   : > { %1699 = vst [vmem:[%s3520_s30] sm:$0xff] %v1698_v11 }
 0x846 PF: > { %s3524_s29 = sld [smem:[#allocation20_spill]]  ;;  %s3525_s6 = sld [smem:[#allocation25_spill]] }
 0x847   : > { %p2290_p11 = scmp.ge.s32.totalorder %s2718_s20, 2 }
 0x84c   : > { %s1743_s19 = sand.u32 1, %s3524_s29   ;;  %p3526_p4 = scmp.ne.s32.totalorder %s3525_s6, 0 }
 0x84d   : > { %s1744_s22 = scalar_lea.sflag [#allocation4], %s1743_s19 }
 0x84e   : > { %p2286_p0 = pnand %p2290_p11, %p3526_p4 }
 0x850   : > { %2701 = dma.done.wait (!%p2286_p0), %s1744_s22, 640  }
 0x851   : > { %2703 = vsyncadd (!%p2286_p0), %s1744_s22, 4294966656  ;;  %s3527_s20 = sld [smem:[#allocation22_spill]]  ;;  %s3528_s0 = sld [smem:[#allocation21_spill]] }
 0x852   : > { %s3529_s19 = sld [smem:[#allocation23_spill]]  ;;  %s3530_s17 = smov %s2710_s18 }
 0x857   : > { %p34_p2 = scmp.ge.s32.totalorder %s3527_s20, 6   ;;  %s3531_s18 = smov %s3528_s0 }
 0x859   :  { %36 = sbr.rel (!%p34_p2) target bundleno = 19 (0x13), region = 203 }
 0x860   :  { %1749 = vsyncpa [#allocation3], 1 }
 0x861   :  { %1751 = vsyncpa [#allocation3 + $0x1], 1 }
 0x862   :  { %1752 = vsyncpa [#allocation6], 1 }
 0x863   :  { %1754 = vsyncpa [#allocation6 + $0x1], 1 }
 0x864   :  { %1755 = vsyncpa [#allocation9], 1 }
 0x865   :  { %1757 = vsyncpa [#allocation9 + $0x1], 1 }
 0x866   :  { %1758 = vsyncpa [#allocation12], 1 }
 0x867   :  { %1760 = vsyncpa [#allocation12 + $0x1], 1 }
 0x868   :  { %1761 = vsyncpa [#allocation4], 1 }
 0x869   :  { %1763 = vsyncpa [#allocation4 + $0x1], 1 }

</bundles_post_ra>
